<compile_context>
chip_gen: v6e
topology: v6e:2x2x1
jax: 0.10.0
libtpu: 0.0.40
codegen_flags: <defaults>
</compile_context>

<pallas_src>
import math
import functools

import numpy as np
import jax
import jax.numpy as jnp
from jax.experimental import pallas as pl
from jax.experimental.pallas import tpu as pltpu

ABSOLUTE_MAX = 1000000.0


def _lift(x, r_ref, t_ref, scale, mxu_dtype):
    """Lane-dense degree-2 polynomial RKHS lift.

    phi[:, i*d + j] = (scale*x[:, i]) * (scale*x[:, j]); built as (xs @ R) * (xs @ T) with 0/1
    selection matrices so the repeat/tile pattern is produced by the MXU (no cross-lane work).
    Operands are bf16 (single-pass MXU), products/clip stay f32. Columns >= d_in**2 are zero.
    """
    xs = (x.astype(jnp.float32) * scale).astype(mxu_dtype)
    rep = jnp.dot(xs, r_ref[...], preferred_element_type=jnp.float32)   # xs[:, i]
    til = jnp.dot(xs, t_ref[...], preferred_element_type=jnp.float32)   # xs[:, j]
    return jnp.clip(rep * til, -ABSOLUTE_MAX, ABSOLUTE_MAX)


def _wls_kernel(a_ref, xk_ref, xi_ref, r_ref, t_ref, w_ref, o_ref, acc_ref,
                *, scale, cat_scale, inv_sqrt_in_dim, mxu_dtype):
    k = pl.program_id(1)

    @pl.when(k == 0)
    def _init():
        acc_ref[...] = jnp.zeros_like(acc_ref)

    # --- expansion of this K-block of nodes, recomputed on the fly (never materialized in HBM) ---
    phi_k = _lift(xk_ref[...], r_ref, t_ref, scale, mxu_dtype)          # [tk, d_phi_pad] f32

    # --- neighbor sum: partial A-tile @ phi-tile on the MXU, f32 accumulation ---
    # int8 (or bf16) adjacency is upcast to bf16 right before the dot; 0/1 is exact.
    acc_ref[...] += jnp.dot(a_ref[...].astype(mxu_dtype),
                            phi_k.astype(mxu_dtype),
                            preferred_element_type=jnp.float32)

    @pl.when(k == pl.num_programs(1) - 1)
    def _finalize():
        h = jnp.clip(acc_ref[...], -ABSOLUTE_MAX, ABSOLUTE_MAX)
        if cat_scale > 0.0:
            feat = jnp.concatenate(
                [xi_ref[...].astype(jnp.float32) * cat_scale, h], axis=-1)
        else:
            feat = h + _lift(xi_ref[...], r_ref, t_ref, scale, mxu_dtype)
        feat = jnp.clip(feat, -ABSOLUTE_MAX, ABSOLUTE_MAX)
        # RandomProjection; 1/sqrt(in_dim) applied to the f32 result (not folded into bf16 W).
        proj = jnp.dot(feat.astype(mxu_dtype), w_ref[...],
                       preferred_element_type=jnp.float32)
        o_ref[...] = proj * inv_sqrt_in_dim


def _round_up(x, m):
    return ((x + m - 1) // m) * m


def _pick_tile(n, pref, align):
    """Largest multiple of `align` that divides n and is <= pref (n must be a multiple of align)."""
    pref = max(align, (pref // align) * align)
    t = min(pref, n)
    t = (t // align) * align
    while t > align and n % t != 0:
        t -= align
    return t


def _vmem_cap_bytes():
    """75% of this generation's per-core VMEM (≈48 MiB on v7x, ≈96 MiB on v5e/v6e)."""
    try:
        info = pltpu.get_tpu_info()
        cap = int(getattr(info, "vmem_capacity_bytes", 64 * 1024 * 1024))
    except Exception:
        cap = 64 * 1024 * 1024
    return (cap * 3) // 4


def wls_kernel_layer(adj, features, proj_w, *, scale=1.0, cat_scale=0.0,
                     tm=512, tk=1024, mxu_dtype=jnp.bfloat16):
    """Pallas wrapper. adj:[N,N] (int8/bf16 preferred), features:[N,D_in], proj_w:[D_exp,D_out]
    -> [N, D_out] float32."""
    n, d_in = features.shape
    d_phi = d_in * d_in
    d_exp, d_out = proj_w.shape
    expected = d_phi + (d_in if cat_scale > 0.0 else 0)
    assert d_exp == expected, (d_exp, expected)
    assert adj.shape == (n, n), adj.shape

    # Adjacency: keep narrow in HBM. If a float adjacency is handed in, fall back to an int8 cast
    # (0/1 exact); callers should pre-store int8/bf16 to avoid this extra HBM pass entirely.
    if adj.dtype not in (jnp.int8, jnp.uint8) and adj.dtype != mxu_dtype:
        adj = adj.astype(jnp.int8)

    # Pad N up to a multiple of 128 (never fall back to tile == full dim).
    n_pad = _round_up(n, 128)
    if n_pad != n:
        adj = jnp.pad(adj, ((0, n_pad - n), (0, n_pad - n)))
        features = jnp.pad(features, ((0, n_pad - n), (0, 0)))

    tm = _pick_tile(n_pad, tm, 32)    # 32-aligned sublanes (int8/bf16 packing)
    if n_pad // tm < 2:               # keep >=2 row tiles so v7x's 2 TensorCores both get work
        tm = _pick_tile(n_pad, n_pad // 2, 32)
    tk = _pick_tile(n_pad, tk, 128)   # lane-aligned K blocks
    grid = (n_pad // tm, n_pad // tk)

    # Lane-dense lift width and projection output: pad to multiples of 128.
    d_phi_pad = _round_up(d_phi, 128)
    d_out_pad = _round_up(d_out, 128)

    # Projection weights: pad lift rows / output cols with zeros; bf16 operands (unit-norm cols).
    w = proj_w.astype(jnp.float32)
    if cat_scale > 0.0:
        w_x, w_h = w[:d_in], w[d_in:]
        w_h = jnp.pad(w_h, ((0, d_phi_pad - d_phi), (0, 0)))
        w = jnp.concatenate([w_x, w_h], axis=0)
    else:
        w = jnp.pad(w, ((0, d_phi_pad - d_phi), (0, 0)))
    w = jnp.pad(w, ((0, 0), (0, d_out_pad - d_out))).astype(mxu_dtype)
    d_w_rows = w.shape[0]

    # Selection matrices for the lane-dense degree-2 lift: (x@R)*(x@T) == vec(x outer x),
    # zero in the padded lanes. bf16 (0/1 exact) so the lift matmuls are single-pass MXU.
    rows = jnp.arange(d_in, dtype=jnp.int32)[:, None]
    cols = jnp.arange(d_phi_pad, dtype=jnp.int32)[None, :]
    valid = cols < d_phi
    r_mat = ((cols // d_in == rows) & valid).astype(mxu_dtype)
    t_mat = ((cols % d_in == rows) & valid).astype(mxu_dtype)

    kernel = functools.partial(
        _wls_kernel, scale=float(scale), cat_scale=float(cat_scale),
        inv_sqrt_in_dim=float(1.0 / math.sqrt(d_in)), mxu_dtype=mxu_dtype)

    # VMEM budget: double-buffered tiles + resident small operands + f32 accumulator, 2x headroom,
    # capped per-generation (v7x's 64 MiB per-TC vs v5e/v6e's 128 MiB).
    a_isz = np.dtype(adj.dtype).itemsize
    m_isz = np.dtype(mxu_dtype).itemsize
    need = (2 * tm * tk * a_isz                   # A tile (int8/bf16)
            + 2 * tk * d_in * 4                   # x (K block)
            + 2 * tm * d_in * 4                   # x (row block)
            + 2 * 2 * d_in * d_phi_pad * m_isz    # R, T
            + 2 * d_w_rows * d_out_pad * m_isz    # W
            + 2 * tm * d_out_pad * 4              # out
            + tm * d_phi_pad * 4)                 # f32 accumulator
    vmem_limit = int(min(_vmem_cap_bytes(), max(2 * need, 16 * 1024 * 1024)))

    out = pl.pallas_call(
        kernel,
        out_shape=jax.ShapeDtypeStruct((n_pad, d_out_pad), jnp.float32),
        grid_spec=pltpu.PrefetchScalarGridSpec(
            num_scalar_prefetch=0,
            grid=grid,
            in_specs=[
                pl.BlockSpec((tm, tk), lambda i, k: (i, k)),              # A tile
                pl.BlockSpec((tk, d_in), lambda i, k: (k, 0)),            # x rows for this K block
                pl.BlockSpec((tm, d_in), lambda i, k: (i, 0)),            # x rows for this out block
                pl.BlockSpec((d_in, d_phi_pad), lambda i, k: (0, 0)),     # R (resident)
                pl.BlockSpec((d_in, d_phi_pad), lambda i, k: (0, 0)),     # T (resident)
                pl.BlockSpec((d_w_rows, d_out_pad), lambda i, k: (0, 0)), # W (resident)
            ],
            out_specs=pl.BlockSpec((tm, d_out_pad), lambda i, k: (i, 0)),
            scratch_shapes=[pltpu.VMEM((tm, d_phi_pad), jnp.float32)],
        ),
        compiler_params=pltpu.CompilerParams(
            dimension_semantics=("parallel", "arbitrary"),
            vmem_limit_bytes=vmem_limit),
    )(adj, features, features, r_mat, t_mat, w)

    return out[:n, :d_out]


def _reference(adj, features, proj_w, *, scale, in_dim, cat_scale=0.0):
    xs = features * scale
    phi = (xs[:, :, None] * xs[:, None, :]).reshape(features.shape[0], -1)
    phi = jnp.clip(phi, -ABSOLUTE_MAX, ABSOLUTE_MAX)
    h = jnp.clip(adj @ phi, -ABSOLUTE_MAX, ABSOLUTE_MAX)
    if cat_scale > 0.0:
        feat = jnp.concatenate([features * cat_scale, h], axis=-1)
    else:
        feat = h + phi
    feat = jnp.clip(feat, -ABSOLUTE_MAX, ABSOLUTE_MAX)
    return (feat @ proj_w) / math.sqrt(in_dim)


if __name__ == "__main__":
    key = jax.random.PRNGKey(0)
    k_adj, k_feat, k_proj = jax.random.split(key, 3)

    N = 512          # nodes (exercises a (2, 1) grid with tm=256, tk=512)
    D_IN = 8         # in_dim
    D_EXP = D_IN * D_IN
    D_OUT = 32       # out_dim
    SCALE = 0.5      # expansion scale (kernel_params)

    # Deterministic synthetic graph: dense 0/1 adjacency stored directly as int8, no self loops
    # (avoids the wrapper-side f32 -> narrow-dtype conversion pass entirely).
    adj_i8 = ((jax.random.uniform(k_adj, (N, N)) < 0.3)
              & (~jnp.eye(N, dtype=bool))).astype(jnp.int8)

    # Node features.
    features = jax.random.normal(k_feat, (N, D_IN), dtype=jnp.float32)

    # RandomProjection: gaussian random unit-norm columns (binary=False).
    proj_w = jax.random.normal(k_proj, (D_EXP, D_OUT), dtype=jnp.float32)
    proj_w = proj_w / jnp.linalg.norm(proj_w, axis=0, keepdims=True)

    out = wls_kernel_layer(adj_i8, features, proj_w, scale=SCALE, cat_scale=0.0)
    out = jax.block_until_ready(out)

    ref = _reference(adj_i8.astype(jnp.float32), features, proj_w, scale=SCALE, in_dim=D_IN)
    assert out.shape == (N, D_OUT)
    # bf16 MXU operands with f32 accumulation: compare against the pure-f32 reference with a
    # tolerance sized for bf16 rounding of xs / phi / feat / W.
    max_err = float(jnp.max(jnp.abs(out - ref)))
    ref_mag = float(jnp.max(jnp.abs(ref)))
    assert max_err <= 3e-2 * ref_mag + 1e-3, ("mismatch vs JAX reference", max_err, ref_mag)

    print("KERNEL_OK")
</pallas_src>

<mosaic_0001>
module attributes {stable_mosaic.version = 11 : i64} {
  func.func @_wls_kernel(%arg0: i32, %arg1: i32, %arg2: memref<256x512xi8, #tpu.memory_space<vmem>>, %arg3: memref<512x8xf32, #tpu.memory_space<vmem>>, %arg4: memref<256x8xf32, #tpu.memory_space<vmem>>, %arg5: memref<8x128xbf16, #tpu.memory_space<vmem>>, %arg6: memref<8x128xbf16, #tpu.memory_space<vmem>>, %arg7: memref<128x128xbf16, #tpu.memory_space<vmem>>, %arg8: memref<256x128xf32, #tpu.memory_space<vmem>>, %arg9: memref<256x128xf32, #tpu.memory_space<vmem>>) attributes {dimension_semantics = [#tpu.dimension_semantics<parallel>, #tpu.dimension_semantics<arbitrary>], iteration_bounds = array<i64: 2, 1>, scalar_prefetch = 0 : i64, scratch_operands = 1 : i64, tpu.core_type = #tpu.core_type<tc>, window_params = [{transform_indices = @transform_0, window_bounds = array<i64: 256, 512>}, {transform_indices = @transform_1, window_bounds = array<i64: 512, 8>}, {transform_indices = @transform_2, window_bounds = array<i64: 256, 8>}, {pipeline_mode = #tpu.pipeline_mode<synchronous>, transform_indices = @transform_3, window_bounds = array<i64: 8, 128>}, {pipeline_mode = #tpu.pipeline_mode<synchronous>, transform_indices = @transform_4, window_bounds = array<i64: 8, 128>}, {pipeline_mode = #tpu.pipeline_mode<synchronous>, transform_indices = @transform_5, window_bounds = array<i64: 128, 128>}, {transform_indices = @transform_6, window_bounds = array<i64: 256, 128>}]} {
    %c0_i32 = arith.constant 0 : i32
    %0 = arith.cmpi eq, %arg1, %c0_i32 : i32
    %1 = arith.extui %0 : i1 to i32
    %c0_i32_0 = arith.constant 0 : i32
    %2 = arith.cmpi ne, %1, %c0_i32_0 : i32
    scf.if %2 {
      %cst_19 = arith.constant 0.000000e+00 : f32
      %26 = vector.broadcast %cst_19 : f32 to vector<256x128xf32>
      %c0_20 = arith.constant 0 : index
      %c0_21 = arith.constant 0 : index
      %27 = vector.load %arg9[%c0_20, %c0_21] : memref<256x128xf32, #tpu.memory_space<vmem>>, vector<256x128xf32>
      tpu.vector_store %arg9[%c0_20, %c0_21], %26 {strides = array<i32>} : memref<256x128xf32, #tpu.memory_space<vmem>>, vector<256x128xf32>,
    } else {
    }
    %c0 = arith.constant 0 : index
    %c0_1 = arith.constant 0 : index
    %3 = vector.load %arg3[%c0, %c0_1] : memref<512x8xf32, #tpu.memory_space<vmem>>, vector<512x8xf32>
    %cst = arith.constant 5.000000e-01 : f32
    %4 = vector.broadcast %cst : f32 to vector<512x8xf32>
    %5 = arith.mulf %3, %4 : vector<512x8xf32>
    %6 = arith.truncf %5 : vector<512x8xf32> to vector<512x8xbf16>
    %c0_2 = arith.constant 0 : index
    %c0_3 = arith.constant 0 : index
    %7 = vector.load %arg5[%c0_2, %c0_3] : memref<8x128xbf16, #tpu.memory_space<vmem>>, vector<8x128xbf16>
    %cst_4 = arith.constant dense<0.000000e+00> : vector<512x128xf32>
    %8 = tpu.matmul %6, %7, %cst_4 {dimension_numbers = #tpu.dot_dimension_numbers<[1], [0], [0], [1], [0, 0, 1, 1], [], []>} : vector<512x8xbf16>, vector<8x128xbf16>, vector<512x128xf32> -> vector<512x128xf32>
    %c0_5 = arith.constant 0 : index
    %c0_6 = arith.constant 0 : index
    %9 = vector.load %arg6[%c0_5, %c0_6] : memref<8x128xbf16, #tpu.memory_space<vmem>>, vector<8x128xbf16>
    %cst_7 = arith.constant dense<0.000000e+00> : vector<512x128xf32>
    %10 = tpu.matmul %6, %9, %cst_7 {dimension_numbers = #tpu.dot_dimension_numbers<[1], [0], [0], [1], [0, 0, 1, 1], [], []>} : vector<512x8xbf16>, vector<8x128xbf16>, vector<512x128xf32> -> vector<512x128xf32>
    %11 = arith.mulf %8, %10 : vector<512x128xf32>
    %cst_8 = arith.constant -1.000000e+06 : f32
    %cst_9 = arith.constant 1.000000e+06 : f32
    %12 = vector.broadcast %cst_8 : f32 to vector<512x128xf32>
    %13 = arith.maximumf %12, %11 : vector<512x128xf32>
    %14 = vector.broadcast %cst_9 : f32 to vector<512x128xf32>
    %15 = arith.minimumf %14, %13 : vector<512x128xf32>
    %c0_10 = arith.constant 0 : index
    %c0_11 = arith.constant 0 : index
    %16 = vector.load %arg9[%c0_10, %c0_11] : memref<256x128xf32, #tpu.memory_space<vmem>>, vector<256x128xf32>
    %c0_12 = arith.constant 0 : index
    %c0_13 = arith.constant 0 : index
    %17 = vector.load %arg2[%c0_12, %c0_13] : memref<256x512xi8, #tpu.memory_space<vmem>>, vector<256x512xi8>
    %18 = arith.sitofp %17 : vector<256x512xi8> to vector<256x512xbf16>
    %19 = arith.truncf %15 : vector<512x128xf32> to vector<512x128xbf16>
    %cst_14 = arith.constant dense<0.000000e+00> : vector<256x128xf32>
    %20 = tpu.matmul %18, %19, %cst_14 {dimension_numbers = #tpu.dot_dimension_numbers<[1], [0], [0], [1], [0, 0, 1, 1], [], []>} : vector<256x512xbf16>, vector<512x128xbf16>, vector<256x128xf32> -> vector<256x128xf32>
    %21 = arith.addf %16, %20 : vector<256x128xf32>
    %c0_15 = arith.constant 0 : index
    %c0_16 = arith.constant 0 : index
    %22 = vector.load %arg9[%c0_15, %c0_16] : memref<256x128xf32, #tpu.memory_space<vmem>>, vector<256x128xf32>
    tpu.vector_store %arg9[%c0_15, %c0_16], %21 {strides = array<i32>} : memref<256x128xf32, #tpu.memory_space<vmem>>, vector<256x128xf32>,
    %c0_i32_17 = arith.constant 0 : i32
    %23 = arith.cmpi eq, %arg1, %c0_i32_17 : i32
    %24 = arith.extui %23 : i1 to i32
    %c0_i32_18 = arith.constant 0 : i32
    %25 = arith.cmpi ne, %24, %c0_i32_18 : i32
    scf.if %25 {
      %c0_19 = arith.constant 0 : index
      %c0_20 = arith.constant 0 : index
      %26 = vector.load %arg9[%c0_19, %c0_20] : memref<256x128xf32, #tpu.memory_space<vmem>>, vector<256x128xf32>
      %cst_21 = arith.constant -1.000000e+06 : f32
      %cst_22 = arith.constant 1.000000e+06 : f32
      %27 = vector.broadcast %cst_21 : f32 to vector<256x128xf32>
      %28 = arith.maximumf %27, %26 : vector<256x128xf32>
      %29 = vector.broadcast %cst_22 : f32 to vector<256x128xf32>
      %30 = arith.minimumf %29, %28 : vector<256x128xf32>
      %c0_23 = arith.constant 0 : index
      %c0_24 = arith.constant 0 : index
      %31 = vector.load %arg4[%c0_23, %c0_24] : memref<256x8xf32, #tpu.memory_space<vmem>>, vector<256x8xf32>
      %cst_25 = arith.constant 5.000000e-01 : f32
      %32 = vector.broadcast %cst_25 : f32 to vector<256x8xf32>
      %33 = arith.mulf %31, %32 : vector<256x8xf32>
      %34 = arith.truncf %33 : vector<256x8xf32> to vector<256x8xbf16>
      %c0_26 = arith.constant 0 : index
      %c0_27 = arith.constant 0 : index
      %35 = vector.load %arg5[%c0_26, %c0_27] : memref<8x128xbf16, #tpu.memory_space<vmem>>, vector<8x128xbf16>
      %cst_28 = arith.constant dense<0.000000e+00> : vector<256x128xf32>
      %36 = tpu.matmul %34, %35, %cst_28 {dimension_numbers = #tpu.dot_dimension_numbers<[1], [0], [0], [1], [0, 0, 1, 1], [], []>} : vector<256x8xbf16>, vector<8x128xbf16>, vector<256x128xf32> -> vector<256x128xf32>
      %c0_29 = arith.constant 0 : index
      %c0_30 = arith.constant 0 : index
      %37 = vector.load %arg6[%c0_29, %c0_30] : memref<8x128xbf16, #tpu.memory_space<vmem>>, vector<8x128xbf16>
      %cst_31 = arith.constant dense<0.000000e+00> : vector<256x128xf32>
      %38 = tpu.matmul %34, %37, %cst_31 {dimension_numbers = #tpu.dot_dimension_numbers<[1], [0], [0], [1], [0, 0, 1, 1], [], []>} : vector<256x8xbf16>, vector<8x128xbf16>, vector<256x128xf32> -> vector<256x128xf32>
      %39 = arith.mulf %36, %38 : vector<256x128xf32>
      %cst_32 = arith.constant -1.000000e+06 : f32
      %cst_33 = arith.constant 1.000000e+06 : f32
      %40 = vector.broadcast %cst_32 : f32 to vector<256x128xf32>
      %41 = arith.maximumf %40, %39 : vector<256x128xf32>
      %42 = vector.broadcast %cst_33 : f32 to vector<256x128xf32>
      %43 = arith.minimumf %42, %41 : vector<256x128xf32>
      %44 = arith.addf %30, %43 : vector<256x128xf32>
      %cst_34 = arith.constant -1.000000e+06 : f32
      %cst_35 = arith.constant 1.000000e+06 : f32
      %45 = vector.broadcast %cst_34 : f32 to vector<256x128xf32>
      %46 = arith.maximumf %45, %44 : vector<256x128xf32>
      %47 = vector.broadcast %cst_35 : f32 to vector<256x128xf32>
      %48 = arith.minimumf %47, %46 : vector<256x128xf32>
      %49 = arith.truncf %48 : vector<256x128xf32> to vector<256x128xbf16>
      %c0_36 = arith.constant 0 : index
      %c0_37 = arith.constant 0 : index
      %50 = vector.load %arg7[%c0_36, %c0_37] : memref<128x128xbf16, #tpu.memory_space<vmem>>, vector<128x128xbf16>
      %cst_38 = arith.constant dense<0.000000e+00> : vector<256x128xf32>
      %51 = tpu.matmul %49, %50, %cst_38 {dimension_numbers = #tpu.dot_dimension_numbers<[1], [0], [0], [1], [0, 0, 1, 1], [], []>} : vector<256x128xbf16>, vector<128x128xbf16>, vector<256x128xf32> -> vector<256x128xf32>
      %cst_39 = arith.constant 0.353553385 : f32
      %52 = vector.broadcast %cst_39 : f32 to vector<256x128xf32>
      %53 = arith.mulf %51, %52 : vector<256x128xf32>
      %c0_40 = arith.constant 0 : index
      %c0_41 = arith.constant 0 : index
      %54 = vector.load %arg8[%c0_40, %c0_41] : memref<256x128xf32, #tpu.memory_space<vmem>>, vector<256x128xf32>
      tpu.vector_store %arg8[%c0_40, %c0_41], %53 {strides = array<i32>} : memref<256x128xf32, #tpu.memory_space<vmem>>, vector<256x128xf32>,
    } else {
    }
    return
  }
  func.func @transform_0(%arg0: i32, %arg1: i32) -> (i32, i32) {
    %c0_i32 = arith.constant 0 : i32
    return %arg0, %arg1 : i32, i32
  }
  func.func @transform_1(%arg0: i32, %arg1: i32) -> (i32, i32) {
    %c0_i32 = arith.constant 0 : i32
    %c0_i32_0 = arith.constant 0 : i32
    return %arg1, %c0_i32 : i32, i32
  }
  func.func @transform_2(%arg0: i32, %arg1: i32) -> (i32, i32) {
    %c0_i32 = arith.constant 0 : i32
    %c0_i32_0 = arith.constant 0 : i32
    return %arg0, %c0_i32 : i32, i32
  }
  func.func @transform_3(%arg0: i32, %arg1: i32) -> (i32, i32) {
    %c0_i32 = arith.constant 0 : i32
    %c0_i32_0 = arith.constant 0 : i32
    %c0_i32_1 = arith.constant 0 : i32
    return %c0_i32, %c0_i32_0 : i32, i32
  }
  func.func @transform_4(%arg0: i32, %arg1: i32) -> (i32, i32) {
    %c0_i32 = arith.constant 0 : i32
    %c0_i32_0 = arith.constant 0 : i32
    %c0_i32_1 = arith.constant 0 : i32
    return %c0_i32, %c0_i32_0 : i32, i32
  }
  func.func @transform_5(%arg0: i32, %arg1: i32) -> (i32, i32) {
    %c0_i32 = arith.constant 0 : i32
    %c0_i32_0 = arith.constant 0 : i32
    %c0_i32_1 = arith.constant 0 : i32
    return %c0_i32, %c0_i32_0 : i32, i32
  }
  func.func @transform_6(%arg0: i32, %arg1: i32) -> (i32, i32) {
    %c0_i32 = arith.constant 0 : i32
    %c0_i32_0 = arith.constant 0 : i32
    return %arg0, %c0_i32 : i32, i32
  }
}

</mosaic_0001>

<bundles_post_ra>
// kernel: tpu_custom_call.1
= control target key start
LH: loop header
LB: loop body
LE: loop exit
PB: predicated region body
PF: predicated region fallthrough
CT: control target
= control target key end

     0   :  { %11 = vsyncpa [#allocation4], 0  ;;  %s5349_s0 = inlined_call_operand.vmem [shape: s8[512,512], index: 0, kind: input, shape index: {}]   ;;  %s5350_s1 = inlined_call_operand.vmem [shape: f32[512,8], index: 1, kind: input, shape index: {}]   ;;  %s5351_s2 = inlined_call_operand.vmem [shape: f32[512,8], index: 2, kind: input, shape index: {}]   ;;  %s5352_s3 = inlined_call_operand.vmem [shape: bf16[8,128], index: 3, kind: input, shape index: {}]   ;;  %s5353_s4 = inlined_call_operand.vmem [shape: bf16[8,128], index: 4, kind: input, shape index: {}]   ;;  %s5354_s5 = inlined_call_operand.vmem [shape: bf16[128,128], index: 5, kind: input, shape index: {}]   ;;  %s5355_s6 = inlined_call_operand.hbm [shape: f32[512,128], index: 6, kind: output, shape index: {}]  }
   0x1   :  { %13 = vsyncpa [#allocation4 + $0x1], 0  ;;  %s4185_s21 = smov 0   ;;  %s4187_s22 = smov 0  }
   0x2   :  { %s4189_s23 = smov 0   ;;  %s4191_s24 = smov 0  }
   0x3   :  { %s4193_s25 = smov 0   ;;  %s4195_s26 = smov 0  }
   0x4 LB: > { %s3118_s27 = sadd.s32 4294967295, %s4145_s26   ;;  %s3119_s28 = sadd.s32 4294967294, %s4145_s26   ;;  %s4145_s26 = sphi %s4195_s26, %s19_s26   ;;  %s4141_s25 = sphi %s4193_s25, %s5420_s25   ;;  %s4137_s24 = sphi %s4191_s24, %s5419_s24   ;;  %s4133_s23 = sphi %s4189_s23, %s5418_s23   ;;  %s4129_s22 = sphi %s4187_s22, %s5417_s22   ;;  %s4125_s21 = sphi %s4185_s21, %s5416_s21  }
   0x5   : > { %s31_s29 = sadd.s32 1, %s4141_s25  ;;  %s181_s30 = sadd.s32 1, %s4133_s23 }
   0x6   : > { %p33_p0 = scmp.ge.s32.totalorder %s31_s29, 2  ;;  %p191_p1 = scmp.ne.s32.totalorder %s4133_s23, %s4129_s22 }
   0x7   : > { %p192_p2 = scmp.eq.s32.totalorder %s3118_s27, 1  ;;  %p197_p3 = scmp.ne.s32.totalorder %s4129_s22, %s4125_s21 }
   0x8   : > { %s5422_s29 = smov (%p33_p0, %s31_s29), 0  ;;  %p198_p5 = scmp.eq.s32.totalorder %s3119_s28, 1 }
   0x9   : > { %p4225_p4 = por %p192_p2, %p191_p1  ;;  %s178_s8 = ssub.s32 %s4141_s25, %s5422_s29 }
   0xa   : > { %p3123_p6 = scmp.ge.s32.totalorder %s4145_s26, 1  ;;  %p179_p7 = scmp.eq.s32.totalorder %s178_s8, 0 }
   0xb   : > { %p4232_p8 = por %p198_p5, %p197_p3  ;;  %p258_p9 = scmp.lt.s32.totalorder %s4145_s26, 3 }
   0xc   : > { %s4238_s10 = scalar_select %p179_p7, %s4133_s23, %s181_s30  }
   0xd   : > { %p259_p10 = pnand %p3123_p6, %p258_p9 }
   0xf   : > { %262 = sbr.rel (%p259_p10) target bundleno = 1023 (0x3ff), region = 44 }
  0x14   : > { %v525_v0 = vld [vmem:[%s5352_s3] sm:$0xf]  ;;  %vm623_vm0 = vcmask 1043456   ;;  %v414_v2 = vld [vmem:[%s5350_s1 + $0x188] sm:$0xff]  ;;  %v415_v6 = vld [vmem:[%s5350_s1 + $0x190] sm:$0xff]  ;;  %vm526_vm1 = vcmask 64512  }
  0x15   : > { %v413_v1 = vld [vmem:[%s5350_s1 + $0x180] sm:$0xff]  ;;  %4000 = vmatprep.subr.msk.bf16.mxu1 %vm623_vm0, %v525_v0  ;;  %v625_v3 = vsel %vm623_vm0, %v525_v0, 0  ;;  %v478_v5 = vmul.f32 0.5, %v414_v2  ;;  %v416_v7 = vld [vmem:[%s5350_s1 + $0x198] sm:$0xff]  ;;  %3999 = vmatprep.subr.msk.bf16.mxu0 %vm623_vm0, %v525_v0  ;;  %v479_v9 = vmul.f32 0.5, %v415_v6  ;;  %v418_v11 = vld [vmem:[%s5350_s1 + $0x1a8] sm:$0xff] }
  0x16   : > { %v477_v4 = vmul.f32 0.5, %v413_v1  ;;  %v417_v8 = vld [vmem:[%s5350_s1 + $0x1a0] sm:$0xff]  ;;  %3998 = vmatpush3.bf16.msra.mxu1 %v625_v3  ;;  %v480_v10 = vmul.f32 0.5, %v416_v7  ;;  %v419_v13 = vld [vmem:[%s5350_s1 + $0x1b0] sm:$0xff]  ;;  %3750 = vmatpush3.bf16.msra.mxu0 %v625_v3  ;;  %v482_v15 = vmul.f32 0.5, %v418_v11  ;;  %v420_v16 = vld [vmem:[%s5350_s1 + $0x1b8] sm:$0xff] }
  0x17   : > { %v481_v12 = vmul.f32 0.5, %v417_v8  ;;  %v421_v17 = vld [vmem:[%s5350_s1 + $0x1c0] sm:$0xff]  ;;  %v422_v18 = vld [vmem:[%s5350_s1 + $0x1c8] sm:$0xff]  ;;  %v483_v21 = vmul.f32 0.5, %v419_v13  ;;  %v484_v23 = vmul.f32 0.5, %v420_v16  ;;  %v367_v28 = vld [vmem:[%s5350_s1 + $0x10] sm:$0xff] }
  0x18   : > { %v4267_v14 = vpack.c.bf16 %v478_v5, %v477_v4  ;;  %v4278_v19 = vpack.c.bf16 %v480_v10, %v479_v9  ;;  %v916_v22 = vld [vmem:[%s5353_s4] sm:$0xf]  ;;  %v485_v24 = vmul.f32 0.5, %v421_v17  ;;  %v486_v25 = vmul.f32 0.5, %v422_v18  ;;  %v366_v27 = vld [vmem:[%s5350_s1 + $0x8] sm:$0xff]  ;;  %v368_v32 = vld [vmem:[%s5350_s1 + $0x18] sm:$0xff] }
  0x19   : > { %v4282_v20 = vpack.c.bf16 %v482_v15, %v481_v12  ;;  %4001 = vmatprep.subr.msk.bf16.mxu1 %vm623_vm0, %v916_v22  ;;  %v365_v26 = vld [vmem:[%s5350_s1] sm:$0xff]  ;;  %v918_v29 = vsel %vm623_vm0, %v916_v22, 0  ;;  %v430_v31 = vmul.f32 0.5, %v366_v27  ;;  %v370_v34 = vld [vmem:[%s5350_s1 + $0x28] sm:$0xff]  ;;  %v431_v35 = vmul.f32 0.5, %v367_v28  ;;  %v371_v40 = vld [vmem:[%s5350_s1 + $0x30] sm:$0xff] }
  0x1a   : > { %3799 = vmatprep.mubr.msk.bf16.mxu1 %vm526_vm1, %v4267_v14  ;;  %v429_v30 = vmul.f32 0.5, %v365_v26  ;;  %v369_v33 = vld [vmem:[%s5350_s1 + $0x20] sm:$0xff]  ;;  %v432_v36 = vmul.f32 0.5, %v368_v32  ;;  %v434_v39 = vmul.f32 0.5, %v370_v34  ;;  %v372_v41 = vld [vmem:[%s5350_s1 + $0x38] sm:$0xff]  ;;  %v4317_v42 = vpack.c.bf16 %v484_v23, %v483_v21  ;;  %v374_v45 = vld [vmem:[%s5350_s1 + $0x48] sm:$0xff] }
  0x1b   : > { %3800 = vmatmul.mubr.msk.bf16.vlgmr.msra.gmra.mxu1 %vm526_vm1, %v4278_v19  ;;  %v433_v38 = vmul.f32 0.5, %v369_v33  ;;  %v373_v44 = vld [vmem:[%s5350_s1 + $0x40] sm:$0xff]  ;;  %v4327_v46 = vpack.c.bf16 %v486_v25, %v485_v24  ;;  %v423_v47 = vld [vmem:[%s5350_s1 + $0x1d0] sm:$0xff]  ;;  %v424_v48 = vld [vmem:[%s5350_s1 + $0x1d8] sm:$0xff]  ;;  %v435_v52 = vmul.f32 0.5, %v371_v40  ;;  %v436_v53 = vmul.f32 0.5, %v372_v41 }
  0x1c   : > { %3803 = vmatprep.mubr.msk.bf16.mxu1 %vm526_vm1, %v4282_v20  ;;  %3816 = vmatpush3.bf16.msra.mxu1 %v918_v29  ;;  %v493_v37 = vpack.c.bf16 %v430_v31, %v429_v30  ;;  %v4319_v43 = vpack.c.bf16 %v432_v36, %v431_v35  ;;  %v425_v50 = vld [vmem:[%s5350_s1 + $0x1e0] sm:$0xff]  ;;  %v426_v51 = vld [vmem:[%s5350_s1 + $0x1e8] sm:$0xff]  ;;  %v437_v54 = vmul.f32 0.5, %v373_v44  ;;  %v438_v55 = vmul.f32 0.5, %v374_v45  ;;  %v375_v62 = vld [vmem:[%s5350_s1 + $0x50] sm:$0xff]  ;;  %s3125_s17 = sshll.u32 %s4137_s24, 3 }
  0x1d   : > { %v4336_v49 = vpack.c.bf16 %v434_v39, %v433_v38  ;;  %v487_v56 = vmul.f32 0.5, %v423_v47  ;;  %v488_v57 = vmul.f32 0.5, %v424_v48  ;;  %v489_v58 = vmul.f32 0.5, %v425_v50  ;;  %v376_v63 = vld [vmem:[%s5350_s1 + $0x58] sm:$0xff]  ;;  %v377_v1 = vld [vmem:[%s5350_s1 + $0x60] sm:$0xff]  ;;  %v378_v2 = vld [vmem:[%s5350_s1 + $0x68] sm:$0xff] }
  0x1e   : > { %3751 = vmatprep.mubr.msk.bf16.mxu0 %vm526_vm1, %v493_v37  ;;  %v490_v59 = vmul.f32 0.5, %v426_v51  ;;  %v496_v60 = vpack.c.bf16 %v436_v53, %v435_v52  ;;  %v497_v61 = vpack.c.bf16 %v438_v55, %v437_v54  ;;  %v427_v4 = vld [vmem:[%s5350_s1 + $0x1f0] sm:$0xff]  ;;  %v428_v5 = vld [vmem:[%s5350_s1 + $0x1f8] sm:$0xff]  ;;  %v439_v6 = vmul.f32 0.5, %v375_v62  ;;  %v381_v16 = vld [vmem:[%s5350_s1 + $0x80] sm:$0xff]  ;;  %p305_p11 = scmp.lt.s32.totalorder %s3125_s17, 15 }
  0x1f   : > { %3752 = vmatmul.mubr.msk.bf16.vlgmr.msra.gmra.mxu0 %vm526_vm1, %v4319_v43  ;;  %v4358_v0 = vpack.c.bf16 %v488_v57, %v487_v56  ;;  %v440_v7 = vmul.f32 0.5, %v376_v63  ;;  %v441_v8 = vmul.f32 0.5, %v377_v1  ;;  %v442_v9 = vmul.f32 0.5, %v378_v2  ;;  %v379_v12 = vld [vmem:[%s5350_s1 + $0x70] sm:$0xff]  ;;  %v380_v13 = vld [vmem:[%s5350_s1 + $0x78] sm:$0xff]  ;;  %v382_v17 = vld [vmem:[%s5350_s1 + $0x88] sm:$0xff] }
  0x20   : > { %3755 = vmatprep.mubr.msk.bf16.mxu0 %vm526_vm1, %v4336_v49  ;;  %v4366_v3 = vpack.c.bf16 %v490_v59, %v489_v58  ;;  %v491_v10 = vmul.f32 0.5, %v427_v4  ;;  %v492_v11 = vmul.f32 0.5, %v428_v5  ;;  %v443_v21 = vmul.f32 0.5, %v379_v12  ;;  %v383_v28 = vld [vmem:[%s5350_s1 + $0x90] sm:$0xff]  ;;  %v384_v29 = vld [vmem:[%s5350_s1 + $0x98] sm:$0xff]  ;;  %v385_v30 = vld [vmem:[%s5350_s1 + $0xa0] sm:$0xff] }
  0x21   : > { %v498_v15 = vpack.c.bf16 %v440_v7, %v439_v6  ;;  %v499_v18 = vpack.c.bf16 %v442_v9, %v441_v8  ;;  %v444_v22 = vmul.f32 0.5, %v380_v13  ;;  %v445_v24 = vmul.f32 0.5, %v381_v16  ;;  %v386_v31 = vld [vmem:[%s5350_s1 + $0xa8] sm:$0xff]  ;;  %v387_v38 = vld [vmem:[%s5350_s1 + $0xb0] sm:$0xff]  ;;  %v388_v39 = vld [vmem:[%s5350_s1 + $0xb8] sm:$0xff]  ;;  %s5424_s17 = smov (!%p305_p11, %s3125_s17), 15 }
  0x22   : > { %v4392_v23 = vpack.c.bf16 %v492_v11, %v491_v10  ;;  %v446_v25 = vmul.f32 0.5, %v382_v17  ;;  %v447_v32 = vmul.f32 0.5, %v383_v28  ;;  %v448_v33 = vmul.f32 0.5, %v384_v29  ;;  %v389_v40 = vld [vmem:[%s5350_s1 + $0xc0] sm:$0xff]  ;;  %v390_v41 = vld [vmem:[%s5350_s1 + $0xc8] sm:$0xff]  ;;  %v391_v50 = vld [vmem:[%s5350_s1 + $0xd0] sm:$0xff] }
  0x23   : > { %3804 = vmatmul.mubr.msk.bf16.gmra.mxu1 %vm526_vm1, %v4317_v42  ;;  %v500_v26 = vpack.c.bf16 %v444_v22, %v443_v21  ;;  %v449_v34 = vmul.f32 0.5, %v385_v30  ;;  %v450_v35 = vmul.f32 0.5, %v386_v31  ;;  %v452_v44 = vmul.f32 0.5, %v388_v39  ;;  %v392_v51 = vld [vmem:[%s5350_s1 + $0xd8] sm:$0xff]  ;;  %v393_v52 = vld [vmem:[%s5350_s1 + $0xe0] sm:$0xff]  ;;  %v394_v53 = vld [vmem:[%s5350_s1 + $0xe8] sm:$0xff] }
  0x24   : > { %3807 = vmatprep.mubr.msk.bf16.mxu1 %vm526_vm1, %v4327_v46  ;;  %v501_v27 = vpack.c.bf16 %v446_v25, %v445_v24  ;;  %v502_v36 = vpack.c.bf16 %v448_v33, %v447_v32  ;;  %v453_v45 = vmul.f32 0.5, %v389_v40  ;;  %v454_v47 = vmul.f32 0.5, %v390_v41  ;;  %v397_v62 = vld [vmem:[%s5350_s1 + $0x100] sm:$0xff]  ;;  %v398_v63 = vld [vmem:[%s5350_s1 + $0x108] sm:$0xff]  ;;  %v399_v8 = vld [vmem:[%s5350_s1 + $0x110] sm:$0xff]  ;;  %s3399_s18 = sshll.u32 %s5424_s17, 5 }
  0x25   : > { %v455_v54 = vmul.f32 0.5, %v391_v50  ;;  %v456_v55 = vmul.f32 0.5, %v392_v51  ;;  %v457_v56 = vmul.f32 0.5, %v393_v52  ;;  %v458_v57 = vmul.f32 0.5, %v394_v53  ;;  %v400_v9 = vld [vmem:[%s5350_s1 + $0x118] sm:$0xff]  ;;  %v401_v10 = vld [vmem:[%s5350_s1 + $0x120] sm:$0xff]  ;;  %s4639_s27 = scalar_lea.vmem %s5349_s0, %s3399_s18 }
  0x26   : > { %v461_v4 = vmul.f32 0.5, %v397_v62  ;;  %v462_v5 = vmul.f32 0.5, %v398_v63  ;;  %v402_v11 = vld [vmem:[%s5350_s1 + $0x128] sm:$0xff]  ;;  %v463_v12 = vmul.f32 0.5, %v399_v8  ;;  %v464_v13 = vmul.f32 0.5, %v400_v9  ;;  %v403_v21 = vld [vmem:[%s5350_s1 + $0x130] sm:$0xff] }
  0x27   : > { %3756 = vmatmul.mubr.msk.bf16.gmra.mxu0 %vm526_vm1, %v496_v60  ;;  %v506_v58 = vpack.c.bf16 %v456_v55, %v455_v54  ;;  %v507_v59 = vpack.c.bf16 %v458_v57, %v457_v56  ;;  %v466_v16 = vmul.f32 0.5, %v402_v11  ;;  %v404_v22 = vld [vmem:[%s5350_s1 + $0x138] sm:$0xff]  ;;  %v405_v24 = vld [vmem:[%s5350_s1 + $0x140] sm:$0xff]  ;;  %v406_v25 = vld [vmem:[%s5350_s1 + $0x148] sm:$0xff]  ;;  %s3128_s12 = sshll.u32 %s4137_s24, 5  ;;  %s300_s19 = sand.u32 1, %s4129_s22  }
  0x28   : > { %3759 = vmatprep.mubr.msk.bf16.mxu0 %vm526_vm1, %v497_v61  ;;  %v509_v7 = vpack.c.bf16 %v462_v5, %v461_v4  ;;  %v510_v17 = vpack.c.bf16 %v464_v13, %v463_v12  ;;  %v469_v28 = vmul.f32 0.5, %v405_v24  ;;  %v470_v29 = vmul.f32 0.5, %v406_v25  ;;  %v407_v32 = vld [vmem:[%s5350_s1 + $0x150] sm:$0xff]  ;;  %v408_v33 = vld [vmem:[%s5350_s1 + $0x158] sm:$0xff]  ;;  %p322_p12 = scmp.lt.s32.totalorder %s3128_s12, 63  ;;  %s3124_s20 = sshll.u32 %s300_s19, 8 }
  0x29   : > { %s3400_s28 = sshll.u32 %s4137_s24, 12  ;;  %s5304_s24 = scalar_lea.sflag [#allocation4], %s300_s19 }
  0x2a   : > { %v513_v31 = vpack.c.bf16 %v470_v29, %v469_v28  ;;  %s5426_s12 = smov (!%p322_p12, %s3128_s12), 63  ;;  %s4147_s14 = smov [#allocation3]  }
  0x2b   : > { %3808 = vmatmul.mubr.msk.bf16.gmra.mxu1 %vm526_vm1, %v4358_v0  ;;  %s3129_s13 = sshll.u32 %s5426_s12, 3  ;;  %s5296_s12 = scalar_lea.hbm %s5355_s6, %s3400_s28 }
  0x2c   : > { %3811 = vmatprep.mubr.msk.bf16.mxu1 %vm526_vm1, %v4366_v3  ;;  %s4830_s16 = scalar_lea.vmem %s5351_s2, %s3129_s13  ;;  %s4073_s15 = sshll.u32 %s4147_s14, 4  ;;  %s4074_s15 = int_to_ptr.vmem [resolvable:$false] %s4073_s15 }
  0x2f   : > { %3760 = vmatmul.mubr.msk.bf16.gmra.mxu0 %vm526_vm1, %v498_v15 }
  0x30   : > { %3763 = vmatprep.mubr.msk.bf16.mxu0 %vm526_vm1, %v499_v18 }
  0x33   : > { %3812 = vmatmul.mubr.msk.bf16.gmra.mxu1 %vm526_vm1, %v4392_v23 }
  0x34   : > { %3817 = vmatprep.mubr.msk.bf16.mxu1 %vm526_vm1, %v493_v37  ;;  %v503_v37 = vpack.c.bf16 %v450_v35, %v449_v34  ;;  %v409_v34 = vld [vmem:[%s5350_s1 + $0x160] sm:$0xff]  ;;  %v410_v35 = vld [vmem:[%s5350_s1 + $0x168] sm:$0xff] }
  0x35   : > { %v474_v39 = vmul.f32 0.5, %v410_v35 }
  0x37   : > { %3764 = vmatmul.mubr.msk.bf16.gmra.mxu0 %vm526_vm1, %v500_v26 }
  0x38   : > { %3767 = vmatprep.mubr.msk.bf16.mxu0 %vm526_vm1, %v501_v27 }
  0x3b   : > { %3818 = vmatmul.mubr.msk.bf16.vlgmr.msra.gmra.mxu1 %vm526_vm1, %v4319_v43  ;;  %v451_v43 = vmul.f32 0.5, %v387_v38  ;;  %v473_v38 = vmul.f32 0.5, %v409_v34 }
  0x3c   : > { %3821 = vmatprep.mubr.msk.bf16.mxu1 %vm526_vm1, %v4336_v49  ;;  %v505_v49 = vpack.c.bf16 %v454_v47, %v453_v45 }
  0x3d   : > { %v504_v48 = vpack.c.bf16 %v452_v44, %v451_v43  ;;  %v515_v41 = vpack.c.bf16 %v474_v39, %v473_v38  ;;  %v411_v43 = vld [vmem:[%s5350_s1 + $0x170] sm:$0xff]  ;;  %v412_v44 = vld [vmem:[%s5350_s1 + $0x178] sm:$0xff] }
  0x3e   : > { %v475_v45 = vmul.f32 0.5, %v411_v43  ;;  %v476_v47 = vmul.f32 0.5, %v412_v44 }
  0x3f   : > { %3768 = vmatmul.mubr.msk.bf16.gmra.mxu0 %vm526_vm1, %v502_v36 }
  0x40   : > { %3771 = vmatprep.mubr.msk.bf16.mxu0 %vm526_vm1, %v503_v37 }
  0x43   : > { %3822 = vmatmul.mubr.msk.bf16.gmra.mxu1 %vm526_vm1, %v496_v60  ;;  %v395_v60 = vld [vmem:[%s5350_s1 + $0xf0] sm:$0xff] }
  0x44   : > { %3825 = vmatprep.mubr.msk.bf16.mxu1 %vm526_vm1, %v497_v61  ;;  %v396_v61 = vld [vmem:[%s5350_s1 + $0xf8] sm:$0xff]  ;;  %v459_v1 = vmul.f32 0.5, %v395_v60 }
  0x45   : > { %v460_v2 = vmul.f32 0.5, %v396_v61 }
  0x47   : > { %3772 = vmatmul.mubr.msk.bf16.gmra.mxu0 %vm526_vm1, %v504_v48  ;;  %v508_v6 = vpack.c.bf16 %v460_v2, %v459_v1 }
  0x48   : > { %3775 = vmatprep.mubr.msk.bf16.mxu0 %vm526_vm1, %v505_v49 }
  0x4b   : > { %3826 = vmatmul.mubr.msk.bf16.gmra.mxu1 %vm526_vm1, %v498_v15  ;;  %v465_v15 = vmul.f32 0.5, %v401_v10 }
  0x4c   : > { %3829 = vmatprep.mubr.msk.bf16.mxu1 %vm526_vm1, %v499_v18 }
  0x4d   : > { %v511_v18 = vpack.c.bf16 %v466_v16, %v465_v15 }
  0x4f   : > { %3776 = vmatmul.mubr.msk.bf16.gmra.mxu0 %vm526_vm1, %v506_v58 }
  0x50   : > { %3779 = vmatprep.mubr.msk.bf16.mxu0 %vm526_vm1, %v507_v59 }
  0x53   : > { %3830 = vmatmul.mubr.msk.bf16.gmra.mxu1 %vm526_vm1, %v500_v26  ;;  %v467_v26 = vmul.f32 0.5, %v403_v21 }
  0x54   : > { %3833 = vmatprep.mubr.msk.bf16.mxu1 %vm526_vm1, %v501_v27  ;;  %v468_v27 = vmul.f32 0.5, %v404_v22 }
  0x56   : > { %v512_v30 = vpack.c.bf16 %v468_v27, %v467_v26 }
  0x57   : > { %3780 = vmatmul.mubr.msk.bf16.gmra.mxu0 %vm526_vm1, %v508_v6 }
  0x58   : > { %3783 = vmatprep.mubr.msk.bf16.mxu0 %vm526_vm1, %v509_v7 }
  0x5b   : > { %3834 = vmatmul.mubr.msk.bf16.gmra.mxu1 %vm526_vm1, %v502_v36  ;;  %v471_v36 = vmul.f32 0.5, %v407_v32 }
  0x5c   : > { %3837 = vmatprep.mubr.msk.bf16.mxu1 %vm526_vm1, %v503_v37  ;;  %v472_v37 = vmul.f32 0.5, %v408_v33 }
  0x5e   : > { %v514_v40 = vpack.c.bf16 %v472_v37, %v471_v36 }
  0x5f   : > { %3784 = vmatmul.mubr.msk.bf16.gmra.mxu0 %vm526_vm1, %v510_v17 }
  0x60   : > { %3787 = vmatprep.mubr.msk.bf16.mxu0 %vm526_vm1, %v511_v18 }
  0x63   : > { %3838 = vmatmul.mubr.msk.bf16.gmra.mxu1 %vm526_vm1, %v504_v48  ;;  %v516_v48 = vpack.c.bf16 %v476_v47, %v475_v45 }
  0x64   : > { %3841 = vmatprep.mubr.msk.bf16.mxu1 %vm526_vm1, %v505_v49 }
  0x67   : > { %3788 = vmatmul.mubr.msk.bf16.gmra.mxu0 %vm526_vm1, %v512_v30 }
  0x68   : > { %3791 = vmatprep.mubr.msk.bf16.mxu0 %vm526_vm1, %v513_v31 }
  0x6b   : > { %3842 = vmatmul.mubr.msk.bf16.gmra.mxu1 %vm526_vm1, %v506_v58 }
  0x6c   : > { %3845 = vmatprep.mubr.msk.bf16.mxu1 %vm526_vm1, %v507_v59 }
  0x6f   : > { %3792 = vmatmul.mubr.msk.bf16.gmra.mxu0 %vm526_vm1, %v514_v40 }
  0x70   : > { %3795 = vmatprep.mubr.msk.bf16.mxu0 %vm526_vm1, %v515_v41 }
  0x73   : > { %3846 = vmatmul.mubr.msk.bf16.gmra.mxu1 %vm526_vm1, %v508_v6 }
  0x74   : > { %3849 = vmatprep.mubr.msk.bf16.mxu1 %vm526_vm1, %v509_v7 }
  0x77   : > { %3796 = vmatmul.mubr.msk.bf16.gmra.mxu0 %vm526_vm1, %v516_v48 }
  0x7b   : > { %3850 = vmatmul.mubr.msk.bf16.gmra.mxu1 %vm526_vm1, %v510_v17 }
  0x7c   : > { %3853 = vmatprep.mubr.msk.bf16.mxu1 %vm526_vm1, %v511_v18 }
  0x83   : > { %3854 = vmatmul.mubr.msk.bf16.gmra.mxu1 %vm526_vm1, %v512_v30 }
  0x84   : > { %3857 = vmatprep.mubr.msk.bf16.mxu1 %vm526_vm1, %v513_v31 }
  0x8b   : > { %3858 = vmatmul.mubr.msk.bf16.gmra.mxu1 %vm526_vm1, %v514_v40 }
  0x8c   : > { %3861 = vmatprep.mubr.msk.bf16.mxu1 %vm526_vm1, %v515_v41 }
  0x93   : > { %3862 = vmatmul.mubr.msk.bf16.gmra.mxu1 %vm526_vm1, %v516_v48 }
  0x94   : > { %3865 = vmatprep.mubr.msk.bf16.mxu1 %vm526_vm1, %v4267_v14 }
  0x9b   : > { %3866 = vmatmul.mubr.msk.bf16.gmra.mxu1 %vm526_vm1, %v4278_v19 }
  0x9c   : > { %3869 = vmatprep.mubr.msk.bf16.mxu1 %vm526_vm1, %v4282_v20 }
  0xa3   : > { %3870 = vmatmul.mubr.msk.bf16.gmra.mxu1 %vm526_vm1, %v4317_v42 }
  0xa4   : > { %3873 = vmatprep.mubr.msk.bf16.mxu1 %vm526_vm1, %v4327_v46 }
  0xab   : > { %3874 = vmatmul.mubr.msk.bf16.gmra.mxu1 %vm526_vm1, %v4358_v0 }
  0xac   : > { %3877 = vmatprep.mubr.msk.bf16.mxu1 %vm526_vm1, %v4366_v3 }
  0xb3   : > { %3878 = vmatmul.mubr.msk.bf16.gmra.mxu1 %vm526_vm1, %v4392_v23 }
  0xdb   : > { %v4547_v14 = vpop.f32.mrf.mxu1 }
  0xdc   : > { %5360 = vst [vmem:[#allocation6_spill] sm:$0xff] %v4547_v14 }
  0xdd   : > { %v4549_v19 = vpop.f32.mrf.mxu1 }
  0xde   : > { %5361 = vst [vmem:[#allocation7_spill] sm:$0xff] %v4549_v19 }
  0xdf   : > { %v4551_v20 = vpop.f32.mrf.mxu1  ;;  %v3753_v42 = vpop.f32.mrf.mxu0 }
  0xe0   : > { %5362 = vst [vmem:[#allocation8_spill] sm:$0xff] %v4551_v20 }
  0xe1   : > { %v4553_v49 = vpop.f32.mrf.mxu1  ;;  %v661_v46 = vpop.f32.mrf.mxu0 }
  0xe2   : > { %5363 = vst [vmem:[#allocation9_spill] sm:$0xff] %v4553_v49 }
  0xe3   : > { %v4555_v50 = vpop.f32.mrf.mxu1  ;;  %v3754_v0 = vpop.f32.mrf.mxu0 }
  0xe4   : > { %5364 = vst [vmem:[#allocation10_spill] sm:$0xff] %v4555_v50 }
  0xe5   : > { %v4557_v51 = vpop.f32.mrf.mxu1  ;;  %v4561_v3 = vpop.f32.mrf.mxu0 }
  0xe6   : > { %5365 = vst [vmem:[#allocation11_spill] sm:$0xff] %v4557_v51  ;;  %5367 = vst [vmem:[#allocation13_spill] sm:$0xff] %v4561_v3 }
  0xe7   : > { %v4559_v52 = vpop.f32.mrf.mxu1  ;;  %v3757_v53 = vpop.f32.mrf.mxu0 }
  0xe8   : > { %5366 = vst [vmem:[#allocation12_spill] sm:$0xff] %v4559_v52 }
  0xe9   : > { %v4563_v23 = vpop.f32.mrf.mxu1  ;;  %v677_v55 = vpop.f32.mrf.mxu0 }
  0xea   : > { %5368 = vst [vmem:[#allocation14_spill] sm:$0xff] %v4563_v23 }
  0xeb   : > { %v4565_v54 = vpop.f32.mrf.mxu1  ;;  %v3758_v57 = vpop.f32.mrf.mxu0 }
  0xec   : > { %5369 = vst [vmem:[#allocation15_spill] sm:$0xff] %v4565_v54 }
  0xed   : > { %v4567_v56 = vpop.f32.mrf.mxu1  ;;  %v4571_v59 = vpop.f32.mrf.mxu0 }
  0xee   : > { %5370 = vst [vmem:[#allocation16_spill] sm:$0xff] %v4567_v56 }
  0xef   : > { %v4569_v58 = vpop.f32.mrf.mxu1  ;;  %v4575_v61 = vpop.f32.mrf.mxu0 }
  0xf0   : > { %5371 = vst [vmem:[#allocation17_spill] sm:$0xff] %v4569_v58 }
  0xf1   : > { %v4573_v60 = vpop.f32.mrf.mxu1  ;;  %v4579_v63 = vpop.f32.mrf.mxu0 }
  0xf2   : > { %5372 = vst [vmem:[#allocation18_spill] sm:$0xff] %v4573_v60 }
  0xf3   : > { %v4577_v62 = vpop.f32.mrf.mxu1  ;;  %v4583_v2 = vpop.f32.mrf.mxu0 }
  0xf4   : > { %5373 = vst [vmem:[#allocation19_spill] sm:$0xff] %v4577_v62 }
  0xf5   : > { %v4581_v1 = vpop.f32.mrf.mxu1  ;;  %v4587_v5 = vpop.f32.mrf.mxu0 }
  0xf6   : > { %5374 = vst [vmem:[#allocation20_spill] sm:$0xff] %v4581_v1 }
  0xf7   : > { %v4585_v4 = vpop.f32.mrf.mxu1  ;;  %v4591_v7 = vpop.f32.mrf.mxu0 }
  0xf8   : > { %5375 = vst [vmem:[#allocation21_spill] sm:$0xff] %v4585_v4 }
  0xf9   : > { %v4589_v6 = vpop.f32.mrf.mxu1  ;;  %v4593_v9 = vpop.f32.mrf.mxu0 }
  0xfa   : > { %5376 = vst [vmem:[#allocation22_spill] sm:$0xff] %v4589_v6 }
  0xfb   : > { %v3819_v8 = vpop.f32.mrf.mxu1  ;;  %v4595_v12 = vpop.f32.mrf.mxu0 }
  0xfc   : > { %v1211_v10 = vmul.f32 %v3819_v8, %v3753_v42 }
  0xfd   : > { %v954_v11 = vpop.f32.mrf.mxu1  ;;  %v4599_v16 = vpop.f32.mrf.mxu0 }
  0xfe   : > { %v4597_v13 = vmul.f32 %v954_v11, %v661_v46  ;;  %v3196_v22 = vclamps-f32 %v1211_v10, 1000000.0 }
  0xff   : > { %v3820_v15 = vpop.f32.mrf.mxu1  ;;  %v4603_v21 = vpop.f32.mrf.mxu0 }
 0x100   : > { %5377 = vst [vmem:[#allocation23_spill] sm:$0xff] %v4597_v13  ;;  %v1212_v17 = vmul.f32 %v3820_v15, %v3754_v0 }
 0x101   : > { %v4601_v18 = vpop.f32.mrf.mxu1  ;;  %v4605_v26 = vpop.f32.mrf.mxu0 }
 0x102   : > { %5378 = vst [vmem:[#allocation24_spill] sm:$0xff] %v4601_v18  ;;  %v3197_v24 = vclamps-f32 %v1212_v17, 1000000.0  ;;  %5379 = vst [vmem:[#allocation25_spill] sm:$0xff] %v4605_v26  ;;  %v4646_v17 = vld [vmem:[%s4639_s27 + $0x18] sm:$0xff] }
 0x103   : > { %v3823_v25 = vpop.f32.mrf.mxu1  ;;  %v4609_v30 = vpop.f32.mrf.mxu0  ;;  %5383 = vst [vmem:[#allocation29_spill] sm:$0xff] %v4646_v17 }
 0x104   : > { %v4607_v27 = vpack.c.bf16 %v3197_v24, %v3196_v22  ;;  %v1215_v28 = vmul.f32 %v3823_v25, %v3757_v53  ;;  %v4642_v53 = vld [vmem:[%s4639_s27 + $0x8] sm:$0xff]  ;;  %v1468_v24 = vunpack.c.l.s8.bf16 %v4646_v17 }
 0x105   : > { %v970_v29 = vpop.f32.mrf.mxu1  ;;  %v4613_v33 = vpop.f32.mrf.mxu0  ;;  %5382 = vst [vmem:[#allocation28_spill] sm:$0xff] %v4642_v53  ;;  %v1466_v8 = vunpack.c.l.s8.bf16 %v4642_v53 }
 0x106   : > { %5380 = vst [vmem:[#allocation26_spill] sm:$0xff] %v4607_v27  ;;  %v4611_v31 = vmul.f32 %v970_v29, %v677_v55  ;;  %v3200_v37 = vclamps-f32 %v1215_v28, 1000000.0  ;;  %1754 = vmatprep.mubr.bf16.mxu1 %v1468_v24 }
 0x107   : > { %v3824_v32 = vpop.f32.mrf.mxu1  ;;  %v4617_v36 = vpop.f32.mrf.mxu0  ;;  %1593 = vmatprep.mubr.bf16.mxu0 %v1466_v8 }
 0x108   : > { %v1216_v34 = vmul.f32 %v3824_v32, %v3758_v57 }
 0x109   : > { %v4615_v35 = vpop.f32.mrf.mxu1  ;;  %v4621_v40 = vpop.f32.mrf.mxu0 }
 0x10a   : > { %v3201_v38 = vclamps-f32 %v1216_v34, 1000000.0 }
 0x10b   : > { %v4619_v39 = vpop.f32.mrf.mxu1  ;;  %v4627_v44 = vpop.f32.mrf.mxu0 }
 0x10c   : > { %v4623_v41 = vpack.c.bf16 %v3201_v38, %v3200_v37 }
 0x10d   : > { %v4625_v43 = vpop.f32.mrf.mxu1  ;;  %v4630_v47 = vpop.f32.mrf.mxu0 }
 0x10e   : > { %5381 = vst [vmem:[#allocation27_spill] sm:$0xff] %v4623_v41 }
 0x10f   : > { %v3828_v45 = vpop.f32.mrf.mxu1  ;;  %v3777_v42 = vpop.f32.mrf.mxu0 }
 0x111   : > { %v4632_v48 = vpop.f32.mrf.mxu1  ;;  %v4634_v0 = vpop.f32.mrf.mxu0 }
 0x113   : > { %v3831_v46 = vpop.f32.mrf.mxu1  ;;  %v3778_v57 = vpop.f32.mrf.mxu0 }
 0x114   : > { %v1223_v58 = vmul.f32 %v3831_v46, %v4591_v7 }
 0x115   : > { %v1002_v55 = vpop.f32.mrf.mxu1  ;;  %v760_v15 = vpop.f32.mrf.mxu0 }
 0x116   : > { %v3208_v41 = vclamps-f32 %v1223_v58, 1000000.0  ;;  %v1219_v58 = vmul.f32 %v4619_v39, %v4575_v61 }
 0x117   : > { %v3832_v10 = vpop.f32.mrf.mxu1  ;;  %v3781_v28 = vpop.f32.mrf.mxu0 }
 0x118   : > { %v1224_v56 = vmul.f32 %v3832_v10, %v4595_v12  ;;  %v1221_v12 = vmul.f32 %v1002_v55, %v4593_v9 }
 0x119   : > { %v1005_v11 = vpop.f32.mrf.mxu1  ;;  %v773_v34 = vpop.f32.mrf.mxu0 }
 0x11a   : > { %v3209_v53 = vclamps-f32 %v1224_v56, 1000000.0  ;;  %v1222_v27 = vmul.f32 %v1005_v11, %v4599_v16 }
 0x11b   : > { %v4648_v22 = vpop.f32.mrf.mxu1  ;;  %v3782_v8 = vpop.f32.mrf.mxu0 }
 0x11c   : > { %v1536_v56 = vpack.c.bf16 %v3209_v53, %v3208_v41 }
 0x11d   : > { %v4651_v25 = vpop.f32.mrf.mxu1  ;;  %v776_v14 = vpop.f32.mrf.mxu0 }
 0x11e   : > { %5384 = vst [vmem:[#allocation30_spill] sm:$0xff] %v4651_v25 }
 0x11f   : > { %v4653_v29 = vpop.f32.mrf.mxu1  ;;  %v3785_v51 = vpop.f32.mrf.mxu0 }
 0x121   : > { %v4655_v32 = vpop.f32.mrf.mxu1  ;;  %v4663_v24 = vpop.f32.mrf.mxu0 }
 0x122   : > { %5385 = vst [vmem:[#allocation31_spill] sm:$0xff] %v4663_v24 }
 0x123   : > { %v4657_v37 = vpop.f32.mrf.mxu1  ;;  %v3786_v54 = vpop.f32.mrf.mxu0 }
 0x125   : > { %v4659_v38 = vpop.f32.mrf.mxu1  ;;  %v4668_v18 = vpop.f32.mrf.mxu0 }
 0x127   : > { %v3840_v19 = vpop.f32.mrf.mxu1  ;;  %v3789_v11 = vpop.f32.mrf.mxu0 }
 0x129   : > { %v4661_v49 = vpop.f32.mrf.mxu1 }
 0x12b   : > { %v3843_v20 = vpop.f32.mrf.mxu1 }
 0x12d   : > { %v1050_v17 = vpop.f32.mrf.mxu1 }
 0x12e   : > { %v1233_v9 = vmul.f32 %v1050_v17, %v4634_v0  ;;  %v1230_v17 = vmul.f32 %v4661_v49, %v4630_v47 }
 0x12f   : > { %v3844_v23 = vpop.f32.mrf.mxu1 }
 0x130   : > { %v1236_v3 = vmul.f32 %v3844_v23, %v3778_v57  ;;  %v3215_v47 = vclamps-f32 %v1230_v17, 1000000.0 }
 0x131   : > { %v1053_v50 = vpop.f32.mrf.mxu1 }
 0x132   : > { %v1234_v23 = vmul.f32 %v1053_v50, %v760_v15  ;;  %v1232_v50 = vmul.f32 %v3840_v19, %v4627_v44 }
 0x133   : > { %v3847_v52 = vpop.f32.mrf.mxu1 }
 0x134   : > { %v1239_v6 = vmul.f32 %v3847_v52, %v3781_v28  ;;  %v1235_v52 = vmul.f32 %v3843_v20, %v3777_v42  ;;  %v3219_v39 = vclamps-f32 %v1234_v23, 1000000.0  ;;  %v3204_v42 = vclamps-f32 %v1219_v58, 1000000.0  ;;  %v5386_v23 = vld [vmem:[#allocation27_spill] sm:$0xff]  ;;  %v5389_v58 = vld [vmem:[#allocation13_spill] sm:$0xff] }
 0x135   : > { %v1066_v60 = vpop.f32.mrf.mxu1  ;;  %v3217_v15 = vclamps-f32 %v1232_v50, 1000000.0 }
 0x136   : > { %v1237_v1 = vmul.f32 %v1066_v60, %v773_v34  ;;  %v3224_v25 = vclamps-f32 %v1239_v6, 1000000.0  ;;  %v1220_v60 = vmul.f32 %v3828_v45, %v4583_v2  ;;  %v3221_v34 = vclamps-f32 %v1236_v3, 1000000.0 }
 0x137   : > { %v3848_v4 = vpop.f32.mrf.mxu1 }
 0x138   : > { %v1240_v62 = vmul.f32 %v3848_v4, %v3782_v8  ;;  %v3222_v28 = vclamps-f32 %v1237_v1, 1000000.0  ;;  %v3207_v4 = vclamps-f32 %v1222_v27, 1000000.0  ;;  %v3220_v1 = vclamps-f32 %v1235_v52, 1000000.0  ;;  %v4682_v27 = vpop.f32.mrf.mxu0 }
 0x139   : > { %v1069_v13 = vpop.f32.mrf.mxu1  ;;  %v1228_v52 = vmul.f32 %v4653_v29, %v4609_v30  ;;  %v1226_v29 = vmul.f32 %v4655_v32, %v4613_v33 }
 0x13a   : > { %v3225_v24 = vclamps-f32 %v1240_v62, 1000000.0  ;;  %v1238_v26 = vmul.f32 %v1069_v13, %v776_v14  ;;  %v3206_v62 = vclamps-f32 %v1221_v12, 1000000.0  ;;  %v3205_v13 = vclamps-f32 %v1220_v60, 1000000.0  ;;  %v3790_v57 = vpop.f32.mrf.mxu0 }
 0x13b   : > { %v3851_v10 = vpop.f32.mrf.mxu1  ;;  %v1542_v61 = vpack.c.bf16 %v3221_v34, %v3220_v1  ;;  %v1214_v12 = vmul.f32 %v4615_v35, %v4571_v59  ;;  %v3213_v30 = vclamps-f32 %v1228_v52, 1000000.0  ;;  %v3211_v32 = vclamps-f32 %v1226_v29, 1000000.0 }
 0x13c   : > { %v1544_v7 = vpack.c.bf16 %v3225_v24, %v3224_v25  ;;  %v3223_v46 = vclamps-f32 %v1238_v26, 1000000.0  ;;  %v1243_v6 = vmul.f32 %v3851_v10, %v3785_v51  ;;  %v1218_v26 = vmul.f32 %v4632_v48, %v4587_v5 }
 0x13d   : > { %v4672_v16 = vpop.f32.mrf.mxu1  ;;  %v1535_v3 = vpack.c.bf16 %v3207_v4, %v3206_v62  ;;  %v1231_v5 = vmul.f32 %v4657_v37, %v4617_v36  ;;  %v3218_v48 = vclamps-f32 %v1233_v9, 1000000.0  ;;  %v1534_v19 = vpack.c.bf16 %v3205_v13, %v3204_v42  ;;  %v5390_v62 = vld [vmem:[#allocation24_spill] sm:$0xff]  ;;  %v1433_v42 = vld [vmem:[%s4639_s27] sm:$0xff] }
 0x13e   : > { %3467 = vmatprep.subr.bf16.mxu0 %v1544_v7  ;;  %v1543_v14 = vpack.c.bf16 %v3223_v46, %v3222_v28  ;;  %v3228_v41 = vclamps-f32 %v1243_v6, 1000000.0  ;;  %v3203_v44 = vclamps-f32 %v1218_v26, 1000000.0  ;;  %v1229_v36 = vmul.f32 %v4659_v38, %v4621_v40 }
 0x13f   : > { %v3852_v20 = vpop.f32.mrf.mxu1  ;;  %3468 = vmatpush3.bf16.msra.mxu0 %v1536_v56  ;;  %v3216_v24 = vclamps-f32 %v1231_v5, 1000000.0  ;;  %v1227_v40 = vmul.f32 %v4648_v22, %v4603_v21  ;;  %v3199_v59 = vclamps-f32 %v1214_v12, 1000000.0  ;;  %v5387_v21 = vld [vmem:[#allocation25_spill] sm:$0xff]  ;;  %v5388_v22 = vld [vmem:[#allocation30_spill] sm:$0xff] }
 0x140   : > { %v1244_v2 = vmul.f32 %v3852_v20, %v3786_v54  ;;  %3469 = vmatprep.subr.bf16.mxu0 %v1543_v14  ;;  %v1217_v54 = vmul.f32 %v4625_v43, %v4579_v63  ;;  %v1541_v63 = vpack.c.bf16 %v3219_v39, %v3218_v48  ;;  %v3214_v38 = vclamps-f32 %v1229_v36, 1000000.0 }
 0x141   : > { %v4680_v51 = vpop.f32.mrf.mxu1  ;;  %v1540_v49 = vpack.c.bf16 %v3217_v15, %v3216_v24  ;;  %v3212_v6 = vclamps-f32 %v1227_v40, 1000000.0  ;;  %v1225_v14 = vmul.f32 %v5388_v22, %v5387_v21  ;;  %v1210_v20 = vmul.f32 %v5390_v62, %v5389_v58 }
 0x142   : > { %v3229_v45 = vclamps-f32 %v1244_v2, 1000000.0  ;;  %v3202_v43 = vclamps-f32 %v1217_v54, 1000000.0  ;;  %v1539_v4 = vpack.c.bf16 %v3215_v47, %v3214_v38  ;;  %v1465_v48 = vunpack.c.l.s8.bf16 %v1433_v42 }
 0x143   : > { %v3855_v0 = vpop.f32.mrf.mxu1  ;;  %3470 = vmatpush3.bf16.msra.mxu0 %v1535_v3  ;;  %v1538_v33 = vpack.c.bf16 %v3213_v30, %v3212_v6  ;;  %v3195_v13 = vclamps-f32 %v1210_v20, 1000000.0  ;;  %v4724_v3 = vpop.f32.mrf.mxu0  ;;  %v1469_v24 = vunpack.c.h.s8.bf16 %v1433_v42  ;;  %v5394_v20 = vld [vmem:[#allocation19_spill] sm:$0xff] }
 0x144   : > { %v4688_v53 = vpack.c.bf16 %v3229_v45, %v3228_v41  ;;  %3471 = vmatprep.subr.bf16.mxu0 %v1542_v61  ;;  %v1247_v25 = vmul.f32 %v3855_v0, %v3789_v11  ;;  %v1533_v10 = vpack.c.bf16 %v3203_v44, %v3202_v43  ;;  %v3198_v11 = vclamps-f32 %v4611_v31, 1000000.0  ;;  %v5391_v61 = vld [vmem:[#allocation23_spill] sm:$0xff]  ;;  %v5392_v45 = vld [vmem:[#allocation26_spill] sm:$0xff]  ;;  %v5393_v44 = vld [vmem:[#allocation28_spill] sm:$0xff] }
 0x145   : > { %v4690_v55 = vpop.f32.mrf.mxu1  ;;  %v3210_v31 = vclamps-f32 %v1225_v14, 1000000.0  ;;  %v3194_v39 = vclamps-f32 %v5391_v61, 1000000.0  ;;  %v4729_v5 = vpop.f32.mrf.mxu0  ;;  %v5396_v61 = vld [vmem:[#allocation21_spill] sm:$0xff] }
 0x146   : > { %v3232_v7 = vclamps-f32 %v1247_v25, 1000000.0  ;;  %v1531_v1 = vpack.c.bf16 %v3199_v59, %v3198_v11 }
 0x147   : > { %v3856_v8 = vpop.f32.mrf.mxu1  ;;  %3472 = vmatpush3.bf16.msra.mxu0 %v1534_v19  ;;  %v1537_v50 = vpack.c.bf16 %v3211_v32, %v3210_v31  ;;  %v1529_v54 = vpack.c.bf16 %v3195_v13, %v3194_v39  ;;  %v4736_v17 = vpop.f32.mrf.mxu0  ;;  %v5395_v13 = vld [vmem:[#allocation20_spill] sm:$0xff] }
 0x148   : > { %v1248_v37 = vmul.f32 %v3856_v8, %v3790_v57  ;;  %3473 = vmatprep.subr.bf16.mxu0 %v1541_v63  ;;  %v1470_v57 = vunpack.c.h.s8.bf16 %v5393_v44  ;;  %v1438_v63 = vld [vmem:[%s4639_s27 + $0x28] sm:$0xff]  ;;  %v5397_v44 = vld [vmem:[#allocation17_spill] sm:$0xff] }
 0x149   : > { %v4700_v28 = vpop.f32.mrf.mxu1  ;;  %v3794_v8 = vpop.f32.mrf.mxu0  ;;  %v1478_v38 = vunpack.c.h.s8.bf16 %v1438_v63 }
 0x14a   : > { %v3233_v46 = vclamps-f32 %v1248_v37, 1000000.0  ;;  %v1474_v37 = vunpack.c.l.s8.bf16 %v1438_v63 }
 0x14b   : > { %v4702_v60 = vpop.f32.mrf.mxu1  ;;  %3474 = vmatpush3.bf16.msra.mxu0 %v1533_v10  ;;  %v4747_v10 = vpop.f32.mrf.mxu0 }
 0x14c   : > { %v4706_v56 = vpack.c.bf16 %v3233_v46, %v3232_v7  ;;  %3475 = vmatprep.subr.bf16.mxu0 %v1540_v49  ;;  %v1437_v49 = vld [vmem:[%s4639_s27 + $0x20] sm:$0xff] }
 0x14d   : > { %v4708_v35 = vpop.f32.mrf.mxu1  ;;  %v3797_v7 = vpop.f32.mrf.mxu0  ;;  %v1473_v46 = vunpack.c.l.s8.bf16 %v1437_v49  ;;  %v1477_v6 = vunpack.c.h.s8.bf16 %v1437_v49 }
 0x14f   : > { %v4713_v34 = vpop.f32.mrf.mxu1  ;;  %3476 = vmatpush3.bf16.msra.mxu0 %v5386_v23  ;;  %v837_v30 = vpop.f32.mrf.mxu0 }
 0x150   : > { %3477 = vmatprep.subr.bf16.mxu0 %v1539_v4  ;;  %v1442_v4 = vld [vmem:[%s4639_s27 + $0x48] sm:$0xff] }
 0x151   : > { %v4720_v9 = vpop.f32.mrf.mxu1  ;;  %v3798_v23 = vpop.f32.mrf.mxu0  ;;  %v1482_v22 = vunpack.c.l.s8.bf16 %v1442_v4 }
 0x153   : > { %v3863_v2 = vpop.f32.mrf.mxu1  ;;  %3478 = vmatpush3.bf16.msra.mxu0 %v1531_v1  ;;  %v840_v62 = vpop.f32.mrf.mxu0 }
 0x154   : > { %3479 = vmatprep.subr.bf16.mxu0 %v1538_v33  ;;  %v1441_v33 = vld [vmem:[%s4639_s27 + $0x40] sm:$0xff]  ;;  %v1255_v32 = vmul.f32 %v3863_v2, %v3797_v7  ;;  %v1486_v2 = vunpack.c.h.s8.bf16 %v1442_v4  ;;  %v5399_v7 = vld [vmem:[#allocation15_spill] sm:$0xff]  ;;  %v5401_v4 = vld [vmem:[#allocation16_spill] sm:$0xff] }
 0x155   : > { %v4722_v26 = vpop.f32.mrf.mxu1 }
 0x156   : > { %v3240_v49 = vclamps-f32 %v1255_v32, 1000000.0 }
 0x157   : > { %v3864_v41 = vpop.f32.mrf.mxu1  ;;  %3480 = vmatpush3.bf16.msra.mxu0 %v5392_v45 }
 0x158   : > { %3481 = vmatprep.subr.bf16.mxu0 %v1537_v50  ;;  %v1256_v14 = vmul.f32 %v3864_v41, %v3798_v23 }
 0x159   : > { %v1133_v0 = vpop.f32.mrf.mxu1 }
 0x15a   : > { %v3241_v45 = vclamps-f32 %v1256_v14, 1000000.0  ;;  %v1254_v42 = vmul.f32 %v1133_v0, %v840_v62 }
 0x15b   : > { %v4731_v19 = vpop.f32.mrf.mxu1  ;;  %3482 = vmatpush3.bf16.msra.mxu0 %v1529_v54 }
 0x15c   : > { %v1552_v0 = vpack.c.bf16 %v3241_v45, %v3240_v49  ;;  %v3239_v14 = vclamps-f32 %v1254_v42, 1000000.0 }
 0x15d   : > { %v4734_v15 = vpop.f32.mrf.mxu1 }
 0x15e   : > { %1594 = vmatmul.mubr.bf16.vlgmr.msra.gmra.mxu0 %v1465_v48  ;;  %v1481_v48 = vunpack.c.l.s8.bf16 %v1441_v33 }
 0x15f   : > { %v4738_v25 = vpop.f32.mrf.mxu1  ;;  %1601 = vmatprep.mubr.bf16.mxu0 %v1470_v57 }
 0x161   : > { %v4741_v43 = vpop.f32.mrf.mxu1 }
 0x163   : > { %v4743_v36 = vpop.f32.mrf.mxu1 }
 0x165   : > { %v4745_v12 = vpop.f32.mrf.mxu1 }
 0x166   : > { %1602 = vmatmul.mubr.bf16.gmra.mxu0 %v1469_v24  ;;  %v5398_v24 = vld [vmem:[#allocation22_spill] sm:$0xff] }
 0x167   : > { %v4749_v52 = vpop.f32.mrf.mxu1  ;;  %1609 = vmatprep.mubr.bf16.mxu0 %v1474_v37 }
 0x169   : > { %v4752_v47 = vpop.f32.mrf.mxu1 }
 0x16b   : > { %v3875_v40 = vpop.f32.mrf.mxu1 }
 0x16d   : > { %v1178_v59 = vpop.f32.mrf.mxu1 }
 0x16e   : > { %1610 = vmatmul.mubr.bf16.gmra.mxu0 %v1473_v46  ;;  %v1253_v46 = vmul.f32 %v4722_v26, %v837_v30  ;;  %v2126_v26 = vld [vmem:[%s5352_s3] sm:$0xf] }
 0x16f   : > { %v3876_v29 = vpop.f32.mrf.mxu1  ;;  %1617 = vmatprep.mubr.bf16.mxu0 %v1478_v38  ;;  %v1267_v38 = vmul.f32 %v3875_v40, %v5399_v7  ;;  %v1251_v40 = vmul.f32 %v4702_v60, %v4729_v5  ;;  %4002 = vmatprep.subr.msk.bf16.mxu0 %vm623_vm0, %v2126_v26 }
 0x170   : > { %v1268_v57 = vmul.f32 %v3876_v29, %v5397_v44  ;;  %v5400_v29 = vld [vmem:[#allocation18_spill] sm:$0xff]  ;;  %v3238_v30 = vclamps-f32 %v1253_v46, 1000000.0  ;;  %v5406_v46 = vld [vmem:[#allocation8_spill] sm:$0xff] }
 0x171   : > { %v1181_v11 = vpop.f32.mrf.mxu1  ;;  %v3236_v45 = vclamps-f32 %v1251_v40, 1000000.0 }
 0x172   : > { %v1266_v62 = vmul.f32 %v1181_v11, %v5400_v29  ;;  %v1446_v11 = vld [vmem:[%s4639_s27 + $0x68] sm:$0xff] }
 0x173   : > { %v3879_v21 = vpop.f32.mrf.mxu1  ;;  %v1490_v42 = vunpack.c.l.s8.bf16 %v1446_v11 }
 0x174   : > { %v1271_v1 = vmul.f32 %v3879_v21, %v5394_v20 }
 0x175   : > { %v1194_v58 = vpop.f32.mrf.mxu1 }
 0x176   : > { %1618 = vmatmul.mubr.bf16.gmra.mxu0 %v1477_v6  ;;  %v1269_v50 = vmul.f32 %v1194_v58, %v5395_v13  ;;  %v3256_v41 = vclamps-f32 %v1271_v1, 1000000.0  ;;  %v3253_v58 = vclamps-f32 %v1268_v57, 1000000.0  ;;  %v1265_v1 = vmul.f32 %v1178_v59, %v5401_v4 }
 0x177   : > { %v3880_v31 = vpop.f32.mrf.mxu1  ;;  %1625 = vmatprep.mubr.bf16.mxu0 %v1482_v22  ;;  %v1252_v22 = vmul.f32 %v4713_v34, %v3794_v8  ;;  %v2176_v34 = vsel %vm623_vm0, %v2126_v26, 0  ;;  %v3252_v8 = vclamps-f32 %v1267_v38, 1000000.0  ;;  %v1551_v13 = vpack.c.bf16 %v3239_v14, %v3238_v30  ;;  %v5410_v30 = vld [vmem:[#allocation31_spill] sm:$0xff] }
 0x178   : > { %v1272_v39 = vmul.f32 %v3880_v31, %v5396_v61  ;;  %v3254_v23 = vclamps-f32 %v1269_v50, 1000000.0  ;;  %v1250_v31 = vmul.f32 %v4720_v9, %v4747_v10  ;;  %3882 = vmatpush3.bf16.msra.mxu0 %v2176_v34  ;;  %v5402_v50 = vld [vmem:[#allocation12_spill] sm:$0xff]  ;;  %v3251_v61 = vclamps-f32 %v1266_v62, 1000000.0  ;;  %v1450_v62 = vld [vmem:[%s4639_s27 + $0x88] sm:$0xff] }
 0x179   : > { %v1197_v54 = vpop.f32.mrf.mxu1  ;;  %v3237_v32 = vclamps-f32 %v1252_v22, 1000000.0  ;;  %v1264_v60 = vmul.f32 %v4749_v52, %v5402_v50  ;;  %v1558_v5 = vpack.c.bf16 %v3253_v58, %v3252_v8  ;;  %v1249_v59 = vmul.f32 %v4708_v35, %v4736_v17  ;;  %v5405_v17 = vld [vmem:[#allocation11_spill] sm:$0xff] }
 0x17a   : > { %v3257_v63 = vclamps-f32 %v1272_v39, 1000000.0  ;;  %v1270_v37 = vmul.f32 %v1197_v54, %v5398_v24  ;;  %v1485_v39 = vunpack.c.h.s8.bf16 %v1441_v33  ;;  %v5403_v54 = vld [vmem:[#allocation10_spill] sm:$0xff]  ;;  %v3250_v44 = vclamps-f32 %v1265_v1, 1000000.0 }
 0x17b   : > { %v1550_v9 = vpack.c.bf16 %v3237_v32, %v3236_v45  ;;  %v3235_v10 = vclamps-f32 %v1250_v31, 1000000.0  ;;  %v3249_v57 = vclamps-f32 %v1264_v60, 1000000.0  ;;  %v3234_v33 = vclamps-f32 %v1249_v59, 1000000.0 }
 0x17c   : > { %v1560_v6 = vpack.c.bf16 %v3257_v63, %v3256_v41  ;;  %v3255_v21 = vclamps-f32 %v1270_v37, 1000000.0  ;;  %v5404_v41 = vld [vmem:[#allocation14_spill] sm:$0xff]  ;;  %v1557_v63 = vpack.c.bf16 %v3251_v61, %v3250_v44  ;;  %v1261_v37 = vmul.f32 %v4745_v12, %v5405_v17  ;;  %v1454_v61 = vld [vmem:[%s4639_s27 + $0xa8] sm:$0xff]  ;;  %v1443_v17 = vld [vmem:[%s4639_s27 + $0x50] sm:$0xff] }
 0x17d   : > { %v1262_v52 = vmul.f32 %v4752_v47, %v5404_v41  ;;  %v1445_v24 = vld [vmem:[%s4639_s27 + $0x60] sm:$0xff]  ;;  %v1549_v49 = vpack.c.bf16 %v3235_v10, %v3234_v33  ;;  %v1241_v34 = vmul.f32 %v4672_v16, %v5410_v30  ;;  %v1502_v60 = vunpack.c.h.s8.bf16 %v1450_v62  ;;  %v1444_v41 = vld [vmem:[%s4639_s27 + $0x58] sm:$0xff] }
 0x17e   : > { %v1559_v20 = vpack.c.bf16 %v3255_v21, %v3254_v23  ;;  %3579 = vmatprep.subr.bf16.mxu1 %v1560_v6  ;;  %1626 = vmatmul.mubr.bf16.gmra.mxu0 %v1481_v48  ;;  %v1263_v48 = vmul.f32 %v4743_v36, %v5403_v54  ;;  %v1246_v36 = vmul.f32 %v4700_v28, %v4724_v3  ;;  %v1489_v38 = vunpack.c.l.s8.bf16 %v1445_v24  ;;  %v5407_v21 = vld [vmem:[#allocation6_spill] sm:$0xff]  ;;  %v5408_v3 = vld [vmem:[#allocation9_spill] sm:$0xff]  ;;  %v1439_v54 = vld [vmem:[%s4639_s27 + $0x30] sm:$0xff] }
 0x17f   : > { %3580 = vmatpush3.bf16.msra.mxu1 %v1552_v0  ;;  %1633 = vmatprep.mubr.bf16.mxu0 %v1486_v2  ;;  %v1260_v2 = vmul.f32 %v4738_v25, %v5406_v46  ;;  %v3247_v47 = vclamps-f32 %v1262_v52, 1000000.0  ;;  %v1245_v23 = vmul.f32 %v4690_v55, %v4682_v27  ;;  %v1494_v6 = vunpack.c.h.s8.bf16 %v1446_v11  ;;  %v5409_v55 = vld [vmem:[#allocation7_spill] sm:$0xff]  ;;  %v1435_v11 = vld [vmem:[%s4639_s27 + $0x10] sm:$0xff]  ;;  %v2339_v16 = vld [vmem:[%s5353_s4] sm:$0xf] }
 0x180   : > { %3581 = vmatprep.subr.bf16.mxu1 %v1559_v20  ;;  %v3248_v35 = vclamps-f32 %v1263_v48, 1000000.0  ;;  %v1259_v12 = vmul.f32 %v4731_v19, %v5407_v21  ;;  %v3246_v22 = vclamps-f32 %v1261_v37, 1000000.0  ;;  %v3231_v0 = vclamps-f32 %v1246_v36, 1000000.0 }
 0x181   : > { %v3245_v28 = vclamps-f32 %v1260_v2, 1000000.0  ;;  %v1258_v14 = vmul.f32 %v4741_v43, %v5408_v3  ;;  %v3230_v58 = vclamps-f32 %v1245_v23, 1000000.0  ;;  %v1257_v29 = vmul.f32 %v4734_v15, %v5409_v55  ;;  %v1453_v48 = vld [vmem:[%s4639_s27 + $0xa0] sm:$0xff]  ;;  %v1458_v52 = vld [vmem:[%s4639_s27 + $0xc8] sm:$0xff] }
 0x182   : > { %v1556_v7 = vpack.c.bf16 %v3249_v57, %v3248_v35  ;;  %v1555_v25 = vpack.c.bf16 %v3247_v47, %v3246_v22  ;;  %v3244_v27 = vclamps-f32 %v1259_v12, 1000000.0  ;;  %v1242_v19 = vmul.f32 %v4680_v51, %v4668_v18  ;;  %v1449_v18 = vld [vmem:[%s4639_s27 + $0x80] sm:$0xff]  ;;  %v1462_v47 = vld [vmem:[%s4639_s27 + $0xe8] sm:$0xff]  ;;  %v1447_v12 = vld [vmem:[%s4639_s27 + $0x70] sm:$0xff] }
 0x183   : > { %3582 = vmatpush3.bf16.msra.mxu1 %v1551_v13  ;;  %v1547_v20 = vpack.c.bf16 %v3231_v0, %v3230_v58  ;;  %v3243_v43 = vclamps-f32 %v1258_v14, 1000000.0  ;;  %v1493_v40 = vunpack.c.h.s8.bf16 %v1445_v24  ;;  %v3242_v8 = vclamps-f32 %v1257_v29, 1000000.0  ;;  %v5411_v13 = vld [vmem:[#allocation29_spill] sm:$0xff]  ;;  %v1457_v37 = vld [vmem:[%s4639_s27 + $0xc0] sm:$0xff] }
 0x184   : > { %3583 = vmatprep.subr.bf16.mxu1 %v1558_v5  ;;  %v1554_v26 = vpack.c.bf16 %v3245_v28, %v3244_v27  ;;  %v3227_v4 = vclamps-f32 %v1242_v19, 1000000.0  ;;  %v3226_v1 = vclamps-f32 %v1241_v34, 1000000.0  ;;  %v1467_v32 = vunpack.c.l.s8.bf16 %v1435_v11  ;;  %v1440_v5 = vld [vmem:[%s4639_s27 + $0x38] sm:$0xff]  ;;  %v1461_v22 = vld [vmem:[%s4639_s27 + $0xe0] sm:$0xff] }
 0x185   : > { %v1553_v15 = vpack.c.bf16 %v3243_v43, %v3242_v8  ;;  %v1497_v31 = vunpack.c.l.s8.bf16 %v1449_v18  ;;  %v1472_v50 = vunpack.c.h.s8.bf16 %v5411_v13  ;;  %v1501_v45 = vunpack.c.h.s8.bf16 %v1449_v18  ;;  %v2047_v58 = vld [vmem:[%s4830_s16 + $0x8] sm:$0xff]  ;;  %v1452_v29 = vld [vmem:[%s4639_s27 + $0x98] sm:$0xff]  ;;  %v2048_v43 = vld [vmem:[%s4830_s16 + $0x10] sm:$0xff] }
 0x186   : > { %1634 = vmatmul.mubr.bf16.gmra.mxu0 %v1485_v39  ;;  %v1545_v51 = vpack.c.bf16 %v3227_v4, %v3226_v1  ;;  %v1471_v39 = vunpack.c.h.s8.bf16 %v1435_v11  ;;  %v1476_v59 = vunpack.c.l.s8.bf16 %v1440_v5  ;;  %v1475_v44 = vunpack.c.l.s8.bf16 %v1439_v54  ;;  %v2050_v30 = vld [vmem:[%s4830_s16 + $0x20] sm:$0xff]  ;;  %v2051_v34 = vld [vmem:[%s4830_s16 + $0x28] sm:$0xff]  ;;  %v1451_v4 = vld [vmem:[%s4639_s27 + $0x90] sm:$0xff] }
 0x187   : > { %3584 = vmatpush3.bf16.msra.mxu1 %v1550_v9  ;;  %1641 = vmatprep.mubr.bf16.mxu0 %v1490_v42  ;;  %v1506_v42 = vunpack.c.l.s8.bf16 %v1454_v61  ;;  %v1505_v9 = vunpack.c.l.s8.bf16 %v1453_v48  ;;  %v1480_v10 = vunpack.c.h.s8.bf16 %v1440_v5  ;;  %v1510_v57 = vunpack.c.h.s8.bf16 %v1454_v61  ;;  %v2054_v13 = vld [vmem:[%s4830_s16 + $0x40] sm:$0xff] }
 0x188   : > { %3585 = vmatprep.subr.bf16.mxu1 %v1557_v63  ;;  %v1479_v63 = vunpack.c.h.s8.bf16 %v1439_v54  ;;  %v1509_v33 = vunpack.c.h.s8.bf16 %v1453_v48  ;;  %v1484_v24 = vunpack.c.l.s8.bf16 %v1444_v41  ;;  %v1514_v35 = vunpack.c.l.s8.bf16 %v1458_v52  ;;  %v2056_v48 = vld [vmem:[%s4830_s16 + $0x50] sm:$0xff] }
 0x189   : > { %v1483_v36 = vunpack.c.l.s8.bf16 %v1443_v17  ;;  %v1488_v46 = vunpack.c.h.s8.bf16 %v1444_v41  ;;  %v1518_v2 = vunpack.c.h.s8.bf16 %v1458_v52  ;;  %v1517_v23 = vunpack.c.h.s8.bf16 %v1457_v37  ;;  %v1455_v52 = vld [vmem:[%s4639_s27 + $0xb0] sm:$0xff] }
 0x18a   : > { %v1522_v21 = vunpack.c.l.s8.bf16 %v1462_v47  ;;  %v1491_v0 = vunpack.c.l.s8.bf16 %v1447_v12  ;;  %v1521_v28 = vunpack.c.l.s8.bf16 %v1461_v22  ;;  %v1526_v14 = vunpack.c.h.s8.bf16 %v1462_v47 }
 0x18b   : > { %3586 = vmatpush3.bf16.msra.mxu1 %v1549_v49  ;;  %v1513_v49 = vunpack.c.l.s8.bf16 %v1457_v37  ;;  %v2079_v55 = vmul.f32 0.5, %v2047_v58  ;;  %v1525_v19 = vunpack.c.h.s8.bf16 %v1461_v22  ;;  %v2083_v1 = vmul.f32 0.5, %v2051_v34  ;;  %v2069_v34 = vld [vmem:[%s4830_s16 + $0xb8] sm:$0xff] }
 0x18c   : > { %3587 = vmatprep.subr.bf16.mxu1 %v1556_v7  ;;  %v1448_v7 = vld [vmem:[%s4639_s27 + $0x78] sm:$0xff]  ;;  %v1499_v11 = vunpack.c.l.s8.bf16 %v1451_v4  ;;  %v2086_v5 = vmul.f32 0.5, %v2054_v13 }
 0x18d   : > { %v1496_v3 = vunpack.c.h.s8.bf16 %v1448_v7 }
 0x18e   : > { %1642 = vmatmul.mubr.bf16.gmra.mxu0 %v1489_v38  ;;  %v1487_v38 = vunpack.c.h.s8.bf16 %v1443_v17 }
 0x18f   : > { %3588 = vmatpush3.bf16.msra.mxu1 %v4706_v56  ;;  %1649 = vmatprep.mubr.bf16.mxu0 %v1494_v6  ;;  %v1498_v56 = vunpack.c.l.s8.bf16 %v1450_v62  ;;  %v1492_v6 = vunpack.c.l.s8.bf16 %v1448_v7  ;;  %v1495_v62 = vunpack.c.h.s8.bf16 %v1447_v12 }
 0x190   : > { %3589 = vmatprep.subr.bf16.mxu1 %v1555_v25  ;;  %v2046_v25 = vld [vmem:[%s4830_s16] sm:$0xff] }
 0x191   : > { %v2078_v27 = vmul.f32 0.5, %v2046_v25  ;;  %v2067_v25 = vld [vmem:[%s4830_s16 + $0xa8] sm:$0xff] }
 0x193   : > { %3590 = vmatpush3.bf16.msra.mxu1 %v1547_v20  ;;  %v1500_v20 = vunpack.c.l.s8.bf16 %v1452_v29 }
 0x194   : > { %3591 = vmatprep.subr.bf16.mxu1 %v1554_v26  ;;  %v4835_v26 = vpack.c.bf16 %v2079_v55, %v2078_v27  ;;  %v1459_v55 = vld [vmem:[%s4639_s27 + $0xd0] sm:$0xff] }
 0x196   : > { %1650 = vmatmul.mubr.bf16.gmra.mxu0 %v1493_v40  ;;  %v2049_v40 = vld [vmem:[%s4830_s16 + $0x18] sm:$0xff] }
 0x197   : > { %3592 = vmatpush3.bf16.msra.mxu1 %v4688_v53  ;;  %1657 = vmatprep.mubr.bf16.mxu0 %v1498_v56  ;;  %v2341_v53 = vsel %vm623_vm0, %v2339_v16, 0  ;;  %v2080_v56 = vmul.f32 0.5, %v2048_v43  ;;  %v2081_v8 = vmul.f32 0.5, %v2049_v40 }
 0x198   : > { %3593 = vmatprep.subr.bf16.mxu1 %v1553_v15  ;;  %v2082_v15 = vmul.f32 0.5, %v2050_v30  ;;  %v2068_v30 = vld [vmem:[%s4830_s16 + $0xb0] sm:$0xff] }
 0x199   : > { %v4844_v18 = vpack.c.bf16 %v2081_v8, %v2080_v56  ;;  %v2070_v56 = vld [vmem:[%s4830_s16 + $0xc0] sm:$0xff]  ;;  %v2071_v8 = vld [vmem:[%s4830_s16 + $0xc8] sm:$0xff] }
 0x19b   : > { %3594 = vmatpush3.bf16.msra.mxu1 %v1545_v51  ;;  %v1504_v51 = vunpack.c.h.s8.bf16 %v1452_v29 }
 0x19c   : > { %4003 = vmatprep.subr.msk.bf16.mxu1 %vm623_vm0, %v2339_v16  ;;  %v4846_v16 = vpack.c.bf16 %v2083_v1, %v2082_v15  ;;  %v2101_v15 = vmul.f32 0.5, %v2069_v34  ;;  %v2102_v1 = vmul.f32 0.5, %v2070_v56  ;;  %v4061_v34 = vld [vmem:[%s5354_s5 + $0x38] sm:$0xff]  }
 0x19d   : > { %3949 = vmatprep.subr.bf16.mxu0 %v4061_v34 }
 0x19e   : > { %1755 = vmatmul.mubr.bf16.vlgmr.msra.gmra.mxu1 %v1467_v32  ;;  %1658 = vmatmul.mubr.bf16.gmra.mxu0 %v1497_v31  ;;  %v2052_v32 = vld [vmem:[%s4830_s16 + $0x30] sm:$0xff]  ;;  %v2053_v31 = vld [vmem:[%s4830_s16 + $0x38] sm:$0xff] }
 0x19f   : > { %1762 = vmatprep.mubr.bf16.mxu1 %v1472_v50  ;;  %1665 = vmatprep.mubr.bf16.mxu0 %v1502_v60  ;;  %v2055_v50 = vld [vmem:[%s4830_s16 + $0x48] sm:$0xff]  ;;  %v2084_v60 = vmul.f32 0.5, %v2052_v32  ;;  %v1519_v32 = vunpack.c.h.s8.bf16 %v1459_v55 }
 0x1a0   : > { %3916 = vmatpush3.bf16.msra.mxu1 %v2341_v53  ;;  %v2085_v53 = vmul.f32 0.5, %v2053_v31  ;;  %v2087_v61 = vmul.f32 0.5, %v2055_v50 }
 0x1a2   : > { %v4859_v54 = vpack.c.bf16 %v2087_v61, %v2086_v5  ;;  %v2074_v5 = vld [vmem:[%s4830_s16 + $0xe0] sm:$0xff]  ;;  %v2075_v61 = vld [vmem:[%s4830_s16 + $0xe8] sm:$0xff] }
 0x1a6   : > { %1763 = vmatmul.mubr.bf16.gmra.mxu1 %v1471_v39  ;;  %1666 = vmatmul.mubr.bf16.gmra.mxu0 %v1501_v45  ;;  %v1456_v39 = vld [vmem:[%s4639_s27 + $0xb8] sm:$0xff]  ;;  %v1503_v45 = vunpack.c.h.s8.bf16 %v1451_v4  ;;  %v2100_v4 = vmul.f32 0.5, %v2068_v30 }
 0x1a7   : > { %1770 = vmatprep.mubr.bf16.mxu1 %v1476_v59  ;;  %1673 = vmatprep.mubr.bf16.mxu0 %v1506_v42  ;;  %v4857_v59 = vpack.c.bf16 %v2085_v53, %v2084_v60  ;;  %v1508_v42 = vunpack.c.l.s8.bf16 %v1456_v39  ;;  %v1512_v17 = vunpack.c.h.s8.bf16 %v1456_v39  ;;  %v2072_v60 = vld [vmem:[%s4830_s16 + $0xd0] sm:$0xff]  ;;  %v2073_v53 = vld [vmem:[%s4830_s16 + $0xd8] sm:$0xff] }
 0x1a8   : > { %v4909_v31 = vpack.c.bf16 %v2101_v15, %v2100_v4  ;;  %v2104_v39 = vmul.f32 0.5, %v2072_v60  ;;  %v4062_v15 = vld [vmem:[%s5354_s5 + $0x30] sm:$0xff]   ;;  %v4064_v60 = vld [vmem:[%s5354_s5 + $0x20] sm:$0xff]  }
 0x1ae   : > { %1771 = vmatmul.mubr.bf16.gmra.mxu1 %v1475_v44  ;;  %1674 = vmatmul.mubr.bf16.gmra.mxu0 %v1505_v9  ;;  %v2057_v44 = vld [vmem:[%s4830_s16 + $0x58] sm:$0xff]  ;;  %v2058_v9 = vld [vmem:[%s4830_s16 + $0x60] sm:$0xff] }
 0x1af   : > { %1778 = vmatprep.mubr.bf16.mxu1 %v1480_v10  ;;  %1681 = vmatprep.mubr.bf16.mxu0 %v1510_v57  ;;  %v2059_v10 = vld [vmem:[%s4830_s16 + $0x68] sm:$0xff]  ;;  %v2088_v57 = vmul.f32 0.5, %v2056_v48  ;;  %v2089_v41 = vmul.f32 0.5, %v2057_v44  ;;  %v2106_v48 = vmul.f32 0.5, %v2074_v5  ;;  %v2107_v44 = vmul.f32 0.5, %v2075_v61 }
 0x1b6   : > { %1779 = vmatmul.mubr.bf16.gmra.mxu1 %v1479_v63  ;;  %1682 = vmatmul.mubr.bf16.gmra.mxu0 %v1509_v33  ;;  %v2090_v63 = vmul.f32 0.5, %v2058_v9  ;;  %v2091_v33 = vmul.f32 0.5, %v2059_v10 }
 0x1b7   : > { %1786 = vmatprep.mubr.bf16.mxu1 %v1484_v24  ;;  %1689 = vmatprep.mubr.bf16.mxu0 %v1514_v35  ;;  %v1507_v24 = vunpack.c.l.s8.bf16 %v1455_v52  ;;  %v4870_v35 = vpack.c.bf16 %v2089_v41, %v2088_v57  ;;  %v2124_v41 = vpack.c.bf16 %v2107_v44, %v2106_v48 }
 0x1b8   : > { %v4872_v37 = vpack.c.bf16 %v2091_v33, %v2090_v63  ;;  %v2077_v63 = vld [vmem:[%s4830_s16 + $0xf8] sm:$0xff] }
 0x1be   : > { %1787 = vmatmul.mubr.bf16.gmra.mxu1 %v1483_v36  ;;  %1690 = vmatmul.mubr.bf16.gmra.mxu0 %v1513_v49  ;;  %v2060_v36 = vld [vmem:[%s4830_s16 + $0x70] sm:$0xff]  ;;  %v2061_v49 = vld [vmem:[%s4830_s16 + $0x78] sm:$0xff] }
 0x1bf   : > { %1794 = vmatprep.mubr.bf16.mxu1 %v1488_v46  ;;  %1697 = vmatprep.mubr.bf16.mxu0 %v1518_v2  ;;  %v2062_v46 = vld [vmem:[%s4830_s16 + $0x80] sm:$0xff]  ;;  %v2063_v2 = vld [vmem:[%s4830_s16 + $0x88] sm:$0xff]  ;;  %v2092_v7 = vmul.f32 0.5, %v2060_v36  ;;  %v2093_v47 = vmul.f32 0.5, %v2061_v49 }
 0x1c1   : > { %v4883_v12 = vpack.c.bf16 %v2093_v47, %v2092_v7 }
 0x1c6   : > { %1795 = vmatmul.mubr.bf16.gmra.mxu1 %v1487_v38  ;;  %1698 = vmatmul.mubr.bf16.gmra.mxu0 %v1517_v23  ;;  %v2094_v38 = vmul.f32 0.5, %v2062_v46  ;;  %v2095_v23 = vmul.f32 0.5, %v2063_v2 }
 0x1c7   : > { %1802 = vmatprep.mubr.bf16.mxu1 %v1492_v6  ;;  %1705 = vmatprep.mubr.bf16.mxu0 %v1522_v21  ;;  %v1460_v6 = vld [vmem:[%s4639_s27 + $0xd8] sm:$0xff]  ;;  %v1511_v21 = vunpack.c.h.s8.bf16 %v1455_v52  ;;  %v2076_v52 = vld [vmem:[%s4830_s16 + $0xf0] sm:$0xff] }
 0x1c8   : > { %v1516_v22 = vunpack.c.l.s8.bf16 %v1460_v6  ;;  %v1520_v43 = vunpack.c.h.s8.bf16 %v1460_v6  ;;  %v2108_v33 = vmul.f32 0.5, %v2076_v52 }
 0x1ce   : > { %1803 = vmatmul.mubr.bf16.gmra.mxu1 %v1491_v0  ;;  %1706 = vmatmul.mubr.bf16.gmra.mxu0 %v1521_v28  ;;  %v4885_v0 = vpack.c.bf16 %v2095_v23, %v2094_v38  ;;  %v2064_v28 = vld [vmem:[%s4830_s16 + $0x90] sm:$0xff] }
 0x1cf   : > { %1810 = vmatprep.mubr.bf16.mxu1 %v1496_v3  ;;  %1713 = vmatprep.mubr.bf16.mxu0 %v1526_v14  ;;  %v2065_v3 = vld [vmem:[%s4830_s16 + $0x98] sm:$0xff]  ;;  %v2066_v14 = vld [vmem:[%s4830_s16 + $0xa0] sm:$0xff]  ;;  %v2096_v58 = vmul.f32 0.5, %v2064_v28  ;;  %s4075_s16 = scalar_lea.vmem %s4074_s15, 8192 }
 0x1d0   : > { %v2097_v27 = vmul.f32 0.5, %v2065_v3  ;;  %v2098_v29 = vmul.f32 0.5, %v2066_v14 }
 0x1d6   : > { %1811 = vmatmul.mubr.bf16.gmra.mxu1 %v1495_v62  ;;  %1714 = vmatmul.mubr.bf16.gmra.mxu0 %v1525_v19  ;;  %v2099_v62 = vmul.f32 0.5, %v2067_v25  ;;  %v1515_v19 = vunpack.c.l.s8.bf16 %v1459_v55 }
 0x1d7   : > { %1818 = vmatprep.mubr.bf16.mxu1 %v1500_v20  ;;  %3883 = vmatprep.mubr.msk.bf16.mxu0 %vm526_vm1, %v4835_v26  ;;  %v4896_v20 = vpack.c.bf16 %v2097_v27, %v2096_v58 }
 0x1d8   : > { %v4898_v40 = vpack.c.bf16 %v2099_v62, %v2098_v29 }
 0x1de   : > { %1819 = vmatmul.mubr.bf16.gmra.mxu1 %v1499_v11  ;;  %3884 = vmatmul.mubr.msk.bf16.vlgmr.msra.gmra.mxu0 %vm526_vm1, %v4844_v18  ;;  %v2103_v11 = vmul.f32 0.5, %v2071_v8 }
 0x1df   : > { %1826 = vmatprep.mubr.bf16.mxu1 %v1504_v51  ;;  %3887 = vmatprep.mubr.msk.bf16.mxu0 %vm526_vm1, %v4846_v16  ;;  %v1464_v51 = vld [vmem:[%s4639_s27 + $0xf8] sm:$0xff] }
 0x1e0   : > { %v1524_v13 = vunpack.c.l.s8.bf16 %v1464_v51  ;;  %v4911_v50 = vpack.c.bf16 %v2103_v11, %v2102_v1  ;;  %v1528_v57 = vunpack.c.h.s8.bf16 %v1464_v51  ;;  %3950 = vmatpush3.bf16.msra.mxu0 %v4061_v34 }
 0x1e1   : > { %3951 = vmatprep.subr.bf16.mxu0 %v4062_v15 }
 0x1e4   : > { %3952 = vmatpush3.bf16.msra.mxu0 %v4062_v15 }
 0x1e6   : > { %1827 = vmatmul.mubr.bf16.gmra.mxu1 %v1503_v45  ;;  %3888 = vmatmul.mubr.msk.bf16.gmra.mxu0 %vm526_vm1, %v4857_v59  ;;  %v2105_v45 = vmul.f32 0.5, %v2073_v53 }
 0x1e7   : > { %1834 = vmatprep.mubr.bf16.mxu1 %v1508_v42  ;;  %3891 = vmatprep.mubr.msk.bf16.mxu0 %vm526_vm1, %v4859_v54  ;;  %v1463_v42 = vld [vmem:[%s4639_s27 + $0xf0] sm:$0xff]  ;;  %s5259_s27 = scalar_lea.vmem [#allocation3], %s3124_s20 }
 0x1e8   : > { %v1523_v9 = vunpack.c.l.s8.bf16 %v1463_v42  ;;  %v2123_v10 = vpack.c.bf16 %v2105_v45, %v2104_v39  ;;  %v4065_v45 = vld [vmem:[%s5354_s5 + $0x18] sm:$0xff]   ;;  %s3015_s30 = sshll.u32 %s5259_s27, 4  ;;  %s5298_s30 = int_to_ptr.vmem [resolvable:$true] %s3015_s30 }
 0x1e9   : > { %s4069_s13 = scalar_lea.vmem %s5298_s30, 4096  ;;  %p4076_p2 = scmp.lt.s32.totalorder %s5298_s30, %s4074_s15 }
 0x1ea   : > { %p4070_p13 = scmp.ne.s32.totalorder %s5298_s30, %s4069_s13  ;;  %p4077_p3 = scmp.lt.s32.totalorder %s4075_s16, %s4069_s13 }
 0x1ec   : > { %p4071_p0 = pnand %p4070_p13, %p4225_p4  ;;  %p4078_p5 = por %p4077_p3, %p4076_p2 }
 0x1ee   : > { %1835 = vmatmul.mubr.bf16.gmra.mxu1 %v1507_v24  ;;  %3892 = vmatmul.mubr.msk.bf16.gmra.mxu0 %vm526_vm1, %v4870_v35  ;;  %v2109_v24 = vmul.f32 0.5, %v2077_v63  ;;  %p4072_p1 = pneg %p4071_p0 }
 0x1ef   : > { %1842 = vmatprep.mubr.bf16.mxu1 %v1512_v17  ;;  %3895 = vmatprep.mubr.msk.bf16.mxu0 %vm526_vm1, %v4872_v37  ;;  %v1527_v17 = vunpack.c.h.s8.bf16 %v1463_v42 }
 0x1f0   : > { %v2125_v36 = vpack.c.bf16 %v2109_v24, %v2108_v33  ;;  %p4079_p6 = pnand %p4078_p5, %p4072_p1 }
 0x1f6   : > { %1843 = vmatmul.mubr.bf16.gmra.mxu1 %v1511_v21  ;;  %3896 = vmatmul.mubr.msk.bf16.gmra.mxu0 %vm526_vm1, %v4883_v12 }
 0x1f7   : > { %1850 = vmatprep.mubr.bf16.mxu1 %v1516_v22  ;;  %3899 = vmatprep.mubr.msk.bf16.mxu0 %vm526_vm1, %v4885_v0 }
 0x1fe   : > { %1851 = vmatmul.mubr.bf16.gmra.mxu1 %v1515_v19  ;;  %3900 = vmatmul.mubr.msk.bf16.gmra.mxu0 %vm526_vm1, %v4896_v20 }
 0x1ff   : > { %1858 = vmatprep.mubr.bf16.mxu1 %v1520_v43  ;;  %3903 = vmatprep.mubr.msk.bf16.mxu0 %vm526_vm1, %v4898_v40 }
 0x206   : > { %1859 = vmatmul.mubr.bf16.gmra.mxu1 %v1519_v32  ;;  %3904 = vmatmul.mubr.msk.bf16.gmra.mxu0 %vm526_vm1, %v4909_v31  ;;  %v4063_v32 = vld [vmem:[%s5354_s5 + $0x28] sm:$0xff]  }
 0x207   : > { %1866 = vmatprep.mubr.bf16.mxu1 %v1524_v13  ;;  %3907 = vmatprep.mubr.msk.bf16.mxu0 %vm526_vm1, %v4911_v50 }
 0x208   : > { %3953 = vmatprep.subr.bf16.mxu0 %v4063_v32 }
 0x209   : > { %3954 = vmatpush3.bf16.msra.mxu0 %v4063_v32 }
 0x20a   : > { %3955 = vmatprep.subr.bf16.mxu0 %v4064_v60 }
 0x20d   : > { %3956 = vmatpush3.bf16.msra.mxu0 %v4064_v60 }
 0x20e   : > { %1867 = vmatmul.mubr.bf16.gmra.mxu1 %v1523_v9  ;;  %3908 = vmatmul.mubr.msk.bf16.gmra.mxu0 %vm526_vm1, %v2123_v10 }
 0x20f   : > { %1874 = vmatprep.mubr.bf16.mxu1 %v1528_v57  ;;  %3911 = vmatprep.mubr.msk.bf16.mxu0 %vm526_vm1, %v2124_v41 }
 0x210   : > { %3957 = vmatprep.subr.bf16.mxu0 %v4065_v45 }
 0x211   : > { %3958 = vmatpush3.bf16.msra.mxu0 %v4065_v45 }
 0x216   : > { %1875 = vmatmul.mubr.bf16.gmra.mxu1 %v1527_v17  ;;  %3912 = vmatmul.mubr.msk.bf16.gmra.mxu0 %vm526_vm1, %v2125_v36 }
 0x217   : > { %3917 = vmatprep.mubr.msk.bf16.mxu1 %vm526_vm1, %v4835_v26 }
 0x21e   : > { %3918 = vmatmul.mubr.msk.bf16.vlgmr.msra.gmra.mxu1 %vm526_vm1, %v4844_v18  ;;  %v3483_v49 = vpop.f32.mrf.mxu0 }
 0x21f   : > { %3921 = vmatprep.mubr.msk.bf16.mxu1 %vm526_vm1, %v4846_v16 }
 0x220   : > { %v3484_v46 = vpop.f32.mrf.mxu0 }
 0x221   : > { %v4933_v2 = vadd.f32 %v3484_v46, %v3483_v49 }
 0x222   : > { %v4935_v7 = vpop.f32.mrf.mxu0 }
 0x224   : > { %v4937_v47 = vpop.f32.mrf.mxu0 }
 0x225   : > { %v3488_v24 = vadd.f32 %v4937_v47, %v4935_v7 }
 0x226   : > { %3922 = vmatmul.mubr.msk.bf16.gmra.mxu1 %vm526_vm1, %v4857_v59  ;;  %v3489_v38 = vpop.f32.mrf.mxu0 }
 0x227   : > { %3925 = vmatprep.mubr.msk.bf16.mxu1 %vm526_vm1, %v4859_v54 }
 0x228   : > { %v3490_v26 = vpop.f32.mrf.mxu0 }
 0x229   : > { %v4943_v18 = vadd.f32 %v3490_v26, %v3489_v38  ;;  %v4067_v38 = vld [vmem:[%s5354_s5 + $0x8] sm:$0xff]  }
 0x22a   : > { %v4945_v23 = vpop.f32.mrf.mxu0 }
 0x22c   : > { %v4947_v16 = vpop.f32.mrf.mxu0 }
 0x22e   : > { %3926 = vmatmul.mubr.msk.bf16.gmra.mxu1 %vm526_vm1, %v4870_v35  ;;  %v3495_v6 = vpop.f32.mrf.mxu0 }
 0x22f   : > { %3929 = vmatprep.mubr.msk.bf16.mxu1 %vm526_vm1, %v4872_v37 }
 0x230   : > { %v3496_v21 = vpop.f32.mrf.mxu0 }
 0x231   : > { %v4953_v59 = vadd.f32 %v3496_v21, %v3495_v6 }
 0x232   : > { %v4955_v22 = vpop.f32.mrf.mxu0 }
 0x234   : > { %v4957_v54 = vpop.f32.mrf.mxu0 }
 0x235   : > { %v3500_v32 = vadd.f32 %v4957_v54, %v4955_v22 }
 0x236   : > { %3930 = vmatmul.mubr.msk.bf16.gmra.mxu1 %vm526_vm1, %v4883_v12  ;;  %v3501_v28 = vpop.f32.mrf.mxu0 }
 0x237   : > { %3933 = vmatprep.mubr.msk.bf16.mxu1 %vm526_vm1, %v4885_v0 }
 0x238   : > { %v3502_v3 = vpop.f32.mrf.mxu0 }
 0x239   : > { %v4963_v35 = vadd.f32 %v3502_v3, %v3501_v28 }
 0x23a   : > { %v4965_v14 = vpop.f32.mrf.mxu0 }
 0x23c   : > { %v4967_v37 = vpop.f32.mrf.mxu0 }
 0x23d   : > { %v3506_v22 = vadd.f32 %v4967_v37, %v4965_v14 }
 0x23e   : > { %3934 = vmatmul.mubr.msk.bf16.gmra.mxu1 %vm526_vm1, %v4896_v20  ;;  %v3507_v25 = vpop.f32.mrf.mxu0 }
 0x23f   : > { %3937 = vmatprep.mubr.msk.bf16.mxu1 %vm526_vm1, %v4898_v40 }
 0x240   : > { %v3508_v58 = vpop.f32.mrf.mxu0 }
 0x241   : > { %v4973_v12 = vadd.f32 %v3508_v58, %v3507_v25  ;;  %v4068_v25 = vld [vmem:[%s5354_s5] sm:$0xff]  }
 0x242   : > { %v3510_v27 = vpop.f32.mrf.mxu0 }
 0x244   : > { %v3511_v55 = vpop.f32.mrf.mxu0 }
 0x245   : > { %v4975_v0 = vadd.f32 %v3511_v55, %v3510_v27  ;;  %v3494_v55 = vadd.f32 %v4947_v16, %v4945_v23 }
 0x246   : > { %3938 = vmatmul.mubr.msk.bf16.gmra.mxu1 %vm526_vm1, %v4909_v31  ;;  %v3513_v29 = vpop.f32.mrf.mxu0 }
 0x247   : > { %3941 = vmatprep.mubr.msk.bf16.mxu1 %vm526_vm1, %v4911_v50 }
 0x248   : > { %v3514_v62 = vpop.f32.mrf.mxu0 }
 0x249   : > { %v4981_v19 = vadd.f32 %v3514_v62, %v3513_v29 }
 0x24a   : > { %v3516_v20 = vpop.f32.mrf.mxu0 }
 0x24c   : > { %v3517_v43 = vpop.f32.mrf.mxu0 }
 0x24d   : > { %v4983_v40 = vadd.f32 %v3517_v43, %v3516_v20 }
 0x24e   : > { %3942 = vmatmul.mubr.msk.bf16.gmra.mxu1 %vm526_vm1, %v2123_v10  ;;  %v3519_v30 = vpop.f32.mrf.mxu0 }
 0x24f   : > { %3945 = vmatprep.mubr.msk.bf16.mxu1 %vm526_vm1, %v2124_v41  ;;  %v4066_v41 = vld [vmem:[%s5354_s5 + $0x10] sm:$0xff]  }
 0x250   : > { %v3520_v56 = vpop.f32.mrf.mxu0  ;;  %3959 = vmatprep.subr.bf16.mxu0 %v4066_v41 }
 0x251   : > { %v4990_v8 = vadd.f32 %v3520_v56, %v3519_v30  ;;  %3960 = vmatpush3.bf16.msra.mxu0 %v4066_v41 }
 0x252   : > { %v3522_v4 = vpop.f32.mrf.mxu0  ;;  %3961 = vmatprep.subr.bf16.mxu0 %v4067_v38 }
 0x254   : > { %v3523_v1 = vpop.f32.mrf.mxu0 }
 0x255   : > { %v4995_v11 = vadd.f32 %v3523_v1, %v3522_v4  ;;  %3962 = vmatpush3.bf16.msra.mxu0 %v4067_v38 }
 0x256   : > { %3946 = vmatmul.mubr.msk.bf16.gmra.mxu1 %vm526_vm1, %v2125_v36  ;;  %v3525_v51 = vpop.f32.mrf.mxu0  ;;  %3963 = vmatprep.subr.bf16.mxu0 %v4068_v25 }
 0x258   : > { %v3526_v31 = vpop.f32.mrf.mxu0 }
 0x259   : > { %v5001_v13 = vadd.f32 %v3526_v31, %v3525_v51  ;;  %3964 = vmatpush3.bf16.msra.mxu0 %v4068_v25 }
 0x25a   : > { %v3528_v50 = vpop.f32.mrf.mxu0 }
 0x25c   : > { %v3529_v53 = vpop.f32.mrf.mxu0 }
 0x25d   : > { %v5006_v5 = vadd.f32 %v3529_v53, %v3528_v50 }
 0x25e   : > { %v3595_v61 = vpop.f32.mrf.mxu1  ;;  %v3531_v39 = vpop.f32.mrf.mxu0 }
 0x260   : > { %v3596_v42 = vpop.f32.mrf.mxu1  ;;  %v3532_v48 = vpop.f32.mrf.mxu0 }
 0x261   : > { %v3597_v44 = vadd.f32 %v3596_v42, %v3595_v61  ;;  %v5011_v9 = vadd.f32 %v3532_v48, %v3531_v39 }
 0x262   : > { %v3598_v10 = vpop.f32.mrf.mxu1  ;;  %v3534_v57 = vpop.f32.mrf.mxu0 }
 0x263   : > { %v5017_v52 = vadd.f32 %v3597_v44, %v4933_v2 }
 0x264   : > { %v3599_v63 = vpop.f32.mrf.mxu1  ;;  %v3535_v33 = vpop.f32.mrf.mxu0 }
 0x265   : > { %v3600_v17 = vadd.f32 %v3599_v63, %v3598_v10  ;;  %v5021_v36 = vadd.f32 %v3535_v33, %v3534_v57 }
 0x266   : > { %v3601_v49 = vpop.f32.mrf.mxu1  ;;  %v3537_v46 = vpop.f32.mrf.mxu0 }
 0x267   : > { %v5026_v26 = vadd.f32 %v3600_v17, %v3488_v24 }
 0x268   : > { %v3602_v2 = vpop.f32.mrf.mxu1  ;;  %v3538_v6 = vpop.f32.mrf.mxu0 }
 0x269   : > { %v3603_v21 = vadd.f32 %v3602_v2, %v3601_v49  ;;  %v5028_v28 = vadd.f32 %v3538_v6, %v3537_v46 }
 0x26a   : > { %v3604_v7 = vpop.f32.mrf.mxu1  ;;  %v3540_v47 = vpop.f32.mrf.mxu0 }
 0x26b   : > { %v5031_v3 = vadd.f32 %v3603_v21, %v4943_v18 }
 0x26c   : > { %v3605_v58 = vpop.f32.mrf.mxu1  ;;  %v3541_v27 = vpop.f32.mrf.mxu0 }
 0x26d   : > { %v3606_v29 = vadd.f32 %v3605_v58, %v3604_v7  ;;  %v5038_v62 = vadd.f32 %v3541_v27, %v3540_v47 }
 0x26e   : > { %v3607_v20 = vpop.f32.mrf.mxu1  ;;  %v3543_v43 = vpop.f32.mrf.mxu0 }
 0x26f   : > { %v5040_v30 = vadd.f32 %v3606_v29, %v3494_v55 }
 0x270   : > { %v3608_v18 = vpop.f32.mrf.mxu1  ;;  %v3544_v34 = vpop.f32.mrf.mxu0 }
 0x271   : > { %v3609_v56 = vadd.f32 %v3608_v18, %v3607_v20  ;;  %v5042_v4 = vadd.f32 %v3544_v34, %v3543_v43 }
 0x272   : > { %v3610_v15 = vpop.f32.mrf.mxu1  ;;  %v3546_v1 = vpop.f32.mrf.mxu0 }
 0x273   : > { %v5045_v51 = vadd.f32 %v3609_v56, %v4953_v59 }
 0x274   : > { %v3611_v23 = vpop.f32.mrf.mxu1  ;;  %v3547_v16 = vpop.f32.mrf.mxu0 }
 0x275   : > { %v3612_v31 = vadd.f32 %v3611_v23, %v3610_v15  ;;  %v5049_v50 = vadd.f32 %v3547_v16, %v3546_v1 }
 0x276   : > { %v3613_v60 = vpop.f32.mrf.mxu1  ;;  %v3549_v53 = vpop.f32.mrf.mxu0 }
 0x277   : > { %v5051_v61 = vadd.f32 %v3612_v31, %v3500_v32 }
 0x278   : > { %v3614_v39 = vpop.f32.mrf.mxu1  ;;  %v3550_v45 = vpop.f32.mrf.mxu0 }
 0x279   : > { %v3615_v42 = vadd.f32 %v3614_v39, %v3613_v60  ;;  %v5053_v48 = vadd.f32 %v3550_v45, %v3549_v53 }
 0x27a   : > { %v3616_v44 = vpop.f32.mrf.mxu1  ;;  %v3552_v59 = vpop.f32.mrf.mxu0 }
 0x27b   : > { %v5056_v10 = vadd.f32 %v3615_v42, %v4963_v35 }
 0x27c   : > { %v3617_v57 = vpop.f32.mrf.mxu1  ;;  %v3553_v41 = vpop.f32.mrf.mxu0 }
 0x27d   : > { %v3618_v54 = vadd.f32 %v3617_v57, %v3616_v44  ;;  %v5060_v63 = vadd.f32 %v3553_v41, %v3552_v59 }
 0x27e   : > { %v3619_v33 = vpop.f32.mrf.mxu1  ;;  %v3555_v24 = vpop.f32.mrf.mxu0 }
 0x27f   : > { %v5062_v17 = vadd.f32 %v3618_v54, %v3506_v22 }
 0x280   : > { %v3620_v49 = vpop.f32.mrf.mxu1  ;;  %v3556_v46 = vpop.f32.mrf.mxu0 }
 0x281   : > { %v3621_v38 = vadd.f32 %v3620_v49, %v3619_v33  ;;  %v5064_v2 = vadd.f32 %v3556_v46, %v3555_v24 }
 0x282   : > { %v3622_v6 = vpop.f32.mrf.mxu1  ;;  %v3558_v35 = vpop.f32.mrf.mxu0 }
 0x283   : > { %v5067_v21 = vadd.f32 %v3621_v38, %v4973_v12 }
 0x284   : > { %v3623_v7 = vpop.f32.mrf.mxu1  ;;  %v3559_v47 = vpop.f32.mrf.mxu0 }
 0x285   : > { %v3624_v14 = vadd.f32 %v3623_v7, %v3622_v6  ;;  %v5069_v37 = vadd.f32 %v3559_v47, %v3558_v35 }
 0x286   : > { %v3625_v25 = vpop.f32.mrf.mxu1  ;;  %v3561_v58 = vpop.f32.mrf.mxu0 }
 0x287   : > { %v5072_v27 = vadd.f32 %v3624_v14, %v4975_v0 }
 0x288   : > { %v3626_v55 = vpop.f32.mrf.mxu1  ;;  %v3562_v29 = vpop.f32.mrf.mxu0 }
 0x289   : > { %v3627_v20 = vadd.f32 %v3626_v55, %v3625_v25  ;;  %v5074_v43 = vadd.f32 %v3562_v29, %v3561_v58 }
 0x28a   : > { %v3628_v18 = vpop.f32.mrf.mxu1  ;;  %v3564_v34 = vpop.f32.mrf.mxu0 }
 0x28b   : > { %v5077_v12 = vadd.f32 %v3627_v20, %v4981_v19 }
 0x28c   : > { %v3629_v56 = vpop.f32.mrf.mxu1  ;;  %v3565_v15 = vpop.f32.mrf.mxu0 }
 0x28d   : > { %v3630_v1 = vadd.f32 %v3629_v56, %v3628_v18  ;;  %v5079_v23 = vadd.f32 %v3565_v15, %v3564_v34 }
 0x28e   : > { %v3631_v16 = vpop.f32.mrf.mxu1  ;;  %v3567_v32 = vpop.f32.mrf.mxu0 }
 0x28f   : > { %v5082_v0 = vadd.f32 %v3630_v1, %v4983_v40 }
 0x290   : > { %v3632_v31 = vpop.f32.mrf.mxu1  ;;  %v3568_v60 = vpop.f32.mrf.mxu0 }
 0x291   : > { %v3633_v53 = vadd.f32 %v3632_v31, %v3631_v16  ;;  %v5084_v39 = vadd.f32 %v3568_v60, %v3567_v32 }
 0x292   : > { %v3634_v45 = vpop.f32.mrf.mxu1  ;;  %v3570_v42 = vpop.f32.mrf.mxu0 }
 0x293   : > { %v5087_v19 = vadd.f32 %v3633_v53, %v4990_v8 }
 0x294   : > { %v3635_v44 = vpop.f32.mrf.mxu1  ;;  %v3571_v59 = vpop.f32.mrf.mxu0 }
 0x295   : > { %v3636_v57 = vadd.f32 %v3635_v44, %v3634_v45  ;;  %v5089_v41 = vadd.f32 %v3571_v59, %v3570_v42 }
 0x296   : > { %v3637_v22 = vpop.f32.mrf.mxu1  ;;  %v3573_v54 = vpop.f32.mrf.mxu0 }
 0x297   : > { %v5092_v40 = vadd.f32 %v3636_v57, %v4995_v11 }
 0x298   : > { %v3638_v33 = vpop.f32.mrf.mxu1  ;;  %v3574_v24 = vpop.f32.mrf.mxu0 }
 0x299   : > { %v3639_v49 = vadd.f32 %v3638_v33, %v3637_v22  ;;  %v5094_v46 = vadd.f32 %v3574_v24, %v3573_v54 }
 0x29a   : > { %v3640_v38 = vpop.f32.mrf.mxu1  ;;  %v3576_v6 = vpop.f32.mrf.mxu0 }
 0x29b   : > { %v5097_v8 = vadd.f32 %v3639_v49, %v5001_v13 }
 0x29c   : > { %v3641_v35 = vpop.f32.mrf.mxu1  ;;  %v3577_v7 = vpop.f32.mrf.mxu0 }
 0x29d   : > { %v3642_v47 = vadd.f32 %v3641_v35, %v3640_v38  ;;  %v5099_v14 = vadd.f32 %v3577_v7, %v3576_v6 }
 0x29e   : > { %v3643_v25 = vpop.f32.mrf.mxu1  ;;  %v5104_v55 = vpop.f32.mrf.mxu0 }
 0x29f   : > { %v5102_v58 = vadd.f32 %v3642_v47, %v5006_v5 }
 0x2a0   : > { %v3644_v11 = vpop.f32.mrf.mxu1  ;;  %v5109_v13 = vpop.f32.mrf.mxu0 }
 0x2a1   : > { %v3645_v29 = vadd.f32 %v3644_v11, %v3643_v25 }
 0x2a2   : > { %v3646_v20 = vpop.f32.mrf.mxu1  ;;  %v5114_v32 = vpop.f32.mrf.mxu0 }
 0x2a3   : > { %v5107_v18 = vadd.f32 %v3645_v29, %v5011_v9 }
 0x2a4   : > { %v3647_v34 = vpop.f32.mrf.mxu1  ;;  %v5119_v45 = vpop.f32.mrf.mxu0 }
 0x2a5   : > { %v3648_v56 = vadd.f32 %v3647_v34, %v3646_v20 }
 0x2a6   : > { %v3649_v15 = vpop.f32.mrf.mxu1  ;;  %v5124_v57 = vpop.f32.mrf.mxu0 }
 0x2a7   : > { %v5112_v1 = vadd.f32 %v3648_v56, %v5021_v36 }
 0x2a8   : > { %v3650_v16 = vpop.f32.mrf.mxu1  ;;  %v5129_v24 = vpop.f32.mrf.mxu0 }
 0x2a9   : > { %v3651_v5 = vadd.f32 %v3650_v16, %v3649_v15 }
 0x2aa   : > { %v3652_v31 = vpop.f32.mrf.mxu1  ;;  %v5134_v35 = vpop.f32.mrf.mxu0 }
 0x2ab   : > { %v5117_v60 = vadd.f32 %v3651_v5, %v5028_v28 }
 0x2ac   : > { %v3653_v53 = vpop.f32.mrf.mxu1  ;;  %v5139_v11 = vpop.f32.mrf.mxu0 }
 0x2ad   : > { %v3654_v9 = vadd.f32 %v3653_v53, %v3652_v31 }
 0x2ae   : > { %v3655_v42 = vpop.f32.mrf.mxu1  ;;  %v5144_v56 = vpop.f32.mrf.mxu0 }
 0x2af   : > { %v5122_v44 = vadd.f32 %v3654_v9, %v5038_v62 }
 0x2b0   : > { %v3656_v59 = vpop.f32.mrf.mxu1  ;;  %v5149_v31 = vpop.f32.mrf.mxu0 }
 0x2b1   : > { %v3657_v36 = vadd.f32 %v3656_v59, %v3655_v42 }
 0x2b2   : > { %v3658_v22 = vpop.f32.mrf.mxu1  ;;  %v5154_v59 = vpop.f32.mrf.mxu0 }
 0x2b3   : > { %v5127_v54 = vadd.f32 %v3657_v36, %v5042_v4 }
 0x2b4   : > { %v3659_v33 = vpop.f32.mrf.mxu1 }
 0x2b5   : > { %v3660_v28 = vadd.f32 %v3659_v33, %v3658_v22 }
 0x2b6   : > { %v3661_v49 = vpop.f32.mrf.mxu1 }
 0x2b7   : > { %v5132_v38 = vadd.f32 %v3660_v28, %v5049_v50  ;;  %v5159_v28 = vpop.f32.mrf.mxu0 }
 0x2b8   : > { %v3662_v6 = vpop.f32.mrf.mxu1 }
 0x2b9   : > { %v3663_v62 = vadd.f32 %v3662_v6, %v3661_v49 }
 0x2ba   : > { %v3664_v7 = vpop.f32.mrf.mxu1 }
 0x2bb   : > { %v5137_v47 = vadd.f32 %v3663_v62, %v5053_v48 }
 0x2bc   : > { %v3665_v25 = vpop.f32.mrf.mxu1 }
 0x2bd   : > { %v3666_v4 = vadd.f32 %v3665_v25, %v3664_v7  ;;  %v5164_v7 = vpop.f32.mrf.mxu0 }
 0x2be   : > { %v3667_v29 = vpop.f32.mrf.mxu1 }
 0x2bf   : > { %v5142_v20 = vadd.f32 %v3666_v4, %v5060_v63 }
 0x2c0   : > { %v3668_v34 = vpop.f32.mrf.mxu1 }
 0x2c1   : > { %v3669_v50 = vadd.f32 %v3668_v34, %v3667_v29  ;;  %v5169_v34 = vpop.f32.mrf.mxu0 }
 0x2c2   : > { %v3670_v15 = vpop.f32.mrf.mxu1 }
 0x2c3   : > { %v5147_v16 = vadd.f32 %v3669_v50, %v5064_v2 }
 0x2c4   : > { %v3671_v5 = vpop.f32.mrf.mxu1 }
 0x2c5   : > { %v3672_v48 = vadd.f32 %v3671_v5, %v3670_v15 }
 0x2c6   : > { %v3673_v53 = vpop.f32.mrf.mxu1 }
 0x2c7   : > { %v5152_v9 = vadd.f32 %v3672_v48, %v5069_v37  ;;  %v5174_v48 = vpop.f32.mrf.mxu0 }
 0x2c8   : > { %v3674_v42 = vpop.f32.mrf.mxu1 }
 0x2c9   : > { %v3675_v63 = vadd.f32 %v3674_v42, %v3673_v53 }
 0x2ca   : > { %v3676_v36 = vpop.f32.mrf.mxu1 }
 0x2cb   : > { %v5157_v22 = vadd.f32 %v3675_v63, %v5074_v43 }
 0x2cc   : > { %v3677_v33 = vpop.f32.mrf.mxu1 }
 0x2cd   : > { %v3678_v2 = vadd.f32 %v3677_v33, %v3676_v36  ;;  %v5179_v36 = vpop.f32.mrf.mxu0 }
 0x2ce   : > { %v3679_v49 = vpop.f32.mrf.mxu1 }
 0x2cf   : > { %v5162_v6 = vadd.f32 %v3678_v2, %v5079_v23 }
 0x2d0   : > { %v3680_v62 = vpop.f32.mrf.mxu1 }
 0x2d1   : > { %v3681_v37 = vadd.f32 %v3680_v62, %v3679_v49  ;;  %v5185_v62 = vpop.f32.mrf.mxu0 }
 0x2d2   : > { %v3682_v25 = vpop.f32.mrf.mxu1 }
 0x2d3   : > { %v5167_v4 = vadd.f32 %v3681_v37, %v5084_v39 }
 0x2d4   : > { %v3683_v29 = vpop.f32.mrf.mxu1 }
 0x2d5   : > { %v3684_v43 = vadd.f32 %v3683_v29, %v3682_v25 }
 0x2d6   : > { %v3685_v50 = vpop.f32.mrf.mxu1 }
 0x2d7   : > { %v5172_v15 = vadd.f32 %v3684_v43, %v5089_v41 }
 0x2d8   : > { %v3686_v5 = vpop.f32.mrf.mxu1 }
 0x2d9   : > { %5412 = vst [vmem:[#allocation27_spill] sm:$0xff] %v5172_v15  ;;  %v3687_v23 = vadd.f32 %v3686_v5, %v3685_v50  ;;  %v3258_v5 = vclamps-f32 %v5017_v52, 1000000.0 }
 0x2da   : > { %v3688_v53 = vpop.f32.mrf.mxu1 }
 0x2db   : > { %v5177_v42 = vadd.f32 %v3687_v23, %v5094_v46  ;;  %v3260_v46 = vclamps-f32 %v5031_v3, 1000000.0 }
 0x2dc   : > { %v3689_v63 = vpop.f32.mrf.mxu1 }
 0x2dd   : > { %v3690_v39 = vadd.f32 %v3689_v63, %v3688_v53  ;;  %v5191_v53 = vpop.f32.mrf.mxu0 }
 0x2de   : > { %v3919_v33 = vpop.f32.mrf.mxu1 }
 0x2df   : > { %v5182_v2 = vadd.f32 %v3690_v39, %v5099_v14  ;;  %v2506_v49 = vmul.f32 %v3919_v33, %v5104_v55  ;;  %v3261_v14 = vclamps-f32 %v5040_v30, 1000000.0  ;;  %v3259_v33 = vclamps-f32 %v5026_v26, 1000000.0 }
 0x2e0   : > { %v2377_v41 = vpop.f32.mrf.mxu1  ;;  %v3264_v26 = vclamps-f32 %v5056_v10, 1000000.0 }
 0x2e1   : > { %5413 = vst [vmem:[#allocation25_spill] sm:$0xff] %v5182_v2  ;;  %v3324_v37 = vclamps-f32 %v2506_v49, 1000000.0  ;;  %v2504_v25 = vmul.f32 %v2377_v41, %v5109_v13 }
 0x2e2   : > { %v3920_v29 = vpop.f32.mrf.mxu1 }
 0x2e3   : > { %v3322_v43 = vclamps-f32 %v2504_v25, 1000000.0  ;;  %v2507_v50 = vmul.f32 %v3920_v29, %v5114_v32  ;;  %v2602_v55 = vadd.f32 %v3324_v37, %v3260_v46  ;;  %v5197_v29 = vpop.f32.mrf.mxu0 }
 0x2e4   : > { %v2380_v23 = vpop.f32.mrf.mxu1 }
 0x2e5   : > { %v3325_v63 = vclamps-f32 %v2507_v50, 1000000.0  ;;  %v2505_v39 = vmul.f32 %v2380_v23, %v5119_v45  ;;  %v2600_v49 = vadd.f32 %v3322_v43, %v3258_v5  ;;  %v3356_v52 = vclamps-f32 %v2602_v55, 1000000.0 }
 0x2e6   : > { %v3923_v13 = vpop.f32.mrf.mxu1 }
 0x2e7   : > { %v2603_v41 = vadd.f32 %v3325_v63, %v3261_v14  ;;  %v3323_v3 = vclamps-f32 %v2505_v39, 1000000.0  ;;  %v2510_v25 = vmul.f32 %v3923_v13, %v5124_v57  ;;  %v3354_v50 = vclamps-f32 %v2600_v49, 1000000.0  ;;  %v5202_v57 = vpop.f32.mrf.mxu0 }
 0x2e8   : > { %v2393_v32 = vpop.f32.mrf.mxu1  ;;  %v3262_v39 = vclamps-f32 %v5045_v51, 1000000.0 }
 0x2e9   : > { %v3357_v15 = vclamps-f32 %v2603_v41, 1000000.0  ;;  %v2601_v2 = vadd.f32 %v3323_v3, %v3259_v33  ;;  %v2508_v30 = vmul.f32 %v2393_v32, %v5129_v24  ;;  %v3328_v37 = vclamps-f32 %v2510_v25, 1000000.0  ;;  %v5209_v25 = vpop.f32.mrf.mxu0 }
 0x2ea   : > { %v3924_v46 = vpop.f32.mrf.mxu1  ;;  %v3265_v24 = vclamps-f32 %v5062_v17, 1000000.0 }
 0x2eb   : > { %v2697_v45 = vpack.c.bf16 %v3357_v15, %v3356_v52  ;;  %v3355_v23 = vclamps-f32 %v2601_v2, 1000000.0  ;;  %v3326_v43 = vclamps-f32 %v2508_v30, 1000000.0  ;;  %v2511_v5 = vmul.f32 %v3924_v46, %v5134_v35 }
 0x2ec   : > { %v2396_v14 = vpop.f32.mrf.mxu1  ;;  %v2606_v33 = vadd.f32 %v3328_v37, %v3264_v26  ;;  %v3263_v15 = vclamps-f32 %v5051_v61, 1000000.0  ;;  %v3268_v37 = vclamps-f32 %v5077_v12, 1000000.0 }
 0x2ed   : > { %v2509_v63 = vmul.f32 %v2396_v14, %v5139_v11  ;;  %v2696_v55 = vpack.c.bf16 %v3355_v23, %v3354_v50  ;;  %v3329_v13 = vclamps-f32 %v2511_v5, 1000000.0  ;;  %v2604_v35 = vadd.f32 %v3326_v43, %v3262_v39  ;;  %v5215_v43 = vpop.f32.mrf.mxu0 }
 0x2ee   : > { %v3927_v49 = vpop.f32.mrf.mxu1  ;;  %v3360_v17 = vclamps-f32 %v2606_v33, 1000000.0  ;;  %v3266_v50 = vclamps-f32 %v5067_v21, 1000000.0  ;;  %v3269_v5 = vclamps-f32 %v5082_v0, 1000000.0 }
 0x2ef   : > { %v3327_v2 = vclamps-f32 %v2509_v63, 1000000.0  ;;  %v2514_v10 = vmul.f32 %v3927_v49, %v5144_v56  ;;  %3965 = vmatprep.mubr.bf16.mxu0 %v2696_v55  ;;  %v2607_v41 = vadd.f32 %v3329_v13, %v3265_v24  ;;  %v3358_v23 = vclamps-f32 %v2604_v35, 1000000.0  ;;  %v5221_v49 = vpop.f32.mrf.mxu0 }
 0x2f0   : > { %v2409_v3 = vpop.f32.mrf.mxu1  ;;  %3966 = vmatmul.mubr.bf16.vlgmr.msra.gmra.mxu0 %v2697_v45  ;;  %v3267_v55 = vclamps-f32 %v5072_v27, 1000000.0 }
 0x2f1   : > { %v2605_v11 = vadd.f32 %v3327_v2, %v3263_v15  ;;  %v3332_v32 = vclamps-f32 %v2514_v10, 1000000.0  ;;  %v2512_v51 = vmul.f32 %v2409_v3, %v5149_v31  ;;  %v3361_v52 = vclamps-f32 %v2607_v41, 1000000.0 }
 0x2f2   : > { %v3928_v30 = vpop.f32.mrf.mxu1 }
 0x2f3   : > { %v3359_v61 = vclamps-f32 %v2605_v11, 1000000.0  ;;  %v3330_v46 = vclamps-f32 %v2512_v51, 1000000.0  ;;  %v2515_v56 = vmul.f32 %v3928_v30, %v5154_v59  ;;  %v2699_v26 = vpack.c.bf16 %v3361_v52, %v3360_v17  ;;  %v5226_v17 = vpop.f32.mrf.mxu0 }
 0x2f4   : > { %v2412_v45 = vpop.f32.mrf.mxu1  ;;  %v2610_v14 = vadd.f32 %v3332_v32, %v3268_v37  ;;  %v3272_v11 = vclamps-f32 %v5097_v8, 1000000.0  ;;  %v3270_v37 = vclamps-f32 %v5087_v19, 1000000.0 }
 0x2f5   : > { %v3333_v31 = vclamps-f32 %v2515_v56, 1000000.0  ;;  %v2513_v63 = vmul.f32 %v2412_v45, %v5159_v28  ;;  %v2698_v39 = vpack.c.bf16 %v3359_v61, %v3358_v23  ;;  %v2608_v24 = vadd.f32 %v3330_v46, %v3266_v50 }
 0x2f6   : > { %v3931_v12 = vpop.f32.mrf.mxu1  ;;  %v3364_v15 = vclamps-f32 %v2610_v14, 1000000.0  ;;  %v3271_v50 = vclamps-f32 %v5092_v40, 1000000.0 }
 0x2f7   : > { %v2611_v33 = vadd.f32 %v3333_v31, %v3269_v5  ;;  %v3331_v59 = vclamps-f32 %v2513_v63, 1000000.0  ;;  %v2518_v21 = vmul.f32 %v3931_v12, %v5164_v7  ;;  %3969 = vmatprep.mubr.bf16.mxu0 %v2698_v39  ;;  %v3362_v27 = vclamps-f32 %v2608_v24, 1000000.0  ;;  %v3909_v5 = vpop.f32.mrf.mxu0 }
 0x2f8   : > { %v2425_v13 = vpop.f32.mrf.mxu1  ;;  %3970 = vmatmul.mubr.bf16.gmra.mxu0 %v2699_v26 }
 0x2f9   : > { %v3365_v2 = vclamps-f32 %v2611_v33, 1000000.0  ;;  %v2609_v0 = vadd.f32 %v3331_v59, %v3267_v55  ;;  %v2516_v10 = vmul.f32 %v2425_v13, %v5169_v34  ;;  %v3336_v28 = vclamps-f32 %v2518_v21, 1000000.0  ;;  %v2308_v21 = vpop.f32.mrf.mxu0 }
 0x2fa   : > { %v3932_v35 = vpop.f32.mrf.mxu1  ;;  %v3273_v34 = vclamps-f32 %v5102_v58, 1000000.0  ;;  %v3276_v55 = vclamps-f32 %v5117_v60, 1000000.0  ;;  %v3277_v13 = vclamps-f32 %v5122_v44, 1000000.0 }
 0x2fb   : > { %v2701_v41 = vpack.c.bf16 %v3365_v2, %v3364_v15  ;;  %v3363_v3 = vclamps-f32 %v2609_v0, 1000000.0  ;;  %v3334_v32 = vclamps-f32 %v2516_v10, 1000000.0  ;;  %v2519_v7 = vmul.f32 %v3932_v35, %v5174_v48 }
 0x2fc   : > { %v2428_v51 = vpop.f32.mrf.mxu1  ;;  %v2614_v61 = vadd.f32 %v3336_v28, %v3272_v11  ;;  %v3275_v0 = vclamps-f32 %v5112_v1, 1000000.0 }
 0x2fd   : > { %v2517_v52 = vmul.f32 %v2428_v51, %v5179_v36  ;;  %v2700_v30 = vpack.c.bf16 %v3363_v3, %v3362_v27  ;;  %v3337_v46 = vclamps-f32 %v2519_v7, 1000000.0  ;;  %v2612_v48 = vadd.f32 %v3334_v32, %v3270_v37 }
 0x2fe   : > { %v3935_v56 = vpop.f32.mrf.mxu1  ;;  %v3368_v19 = vclamps-f32 %v2614_v61, 1000000.0  ;;  %v3280_v37 = vclamps-f32 %v5137_v47, 1000000.0 }
 0x2ff   : > { %v3335_v23 = vclamps-f32 %v2517_v52, 1000000.0  ;;  %v2522_v8 = vmul.f32 %v3935_v56, %v5185_v62  ;;  %3973 = vmatprep.mubr.bf16.mxu0 %v2700_v30  ;;  %v2615_v26 = vadd.f32 %v3337_v46, %v3273_v34  ;;  %v3274_v62 = vclamps-f32 %v5107_v18, 1000000.0 }
 0x300   : > { %v2441_v45 = vpop.f32.mrf.mxu1  ;;  %3974 = vmatmul.mubr.bf16.gmra.mxu0 %v2701_v41  ;;  %v3366_v24 = vclamps-f32 %v2612_v48, 1000000.0  ;;  %v3910_v41 = vpop.f32.mrf.mxu0  ;;  %v3278_v46 = vclamps-f32 %v5127_v54, 1000000.0 }
 0x301   : > { %v2613_v14 = vadd.f32 %v3335_v23, %v3271_v50  ;;  %v3340_v36 = vclamps-f32 %v2522_v8, 1000000.0  ;;  %v2520_v31 = vmul.f32 %v2441_v45, %v5191_v53  ;;  %v3369_v58 = vclamps-f32 %v2615_v26, 1000000.0 }
 0x302   : > { %v3936_v63 = vpop.f32.mrf.mxu1  ;;  %v2311_v61 = vpop.f32.mrf.mxu0  ;;  %v3281_v23 = vclamps-f32 %v5142_v20, 1000000.0  ;;  %v3279_v26 = vclamps-f32 %v5132_v38, 1000000.0  ;;  %v3284_v20 = vclamps-f32 %v5157_v22, 1000000.0 }
 0x303   : > { %v3367_v12 = vclamps-f32 %v2613_v14, 1000000.0  ;;  %v3338_v40 = vclamps-f32 %v2520_v31, 1000000.0  ;;  %v2523_v39 = vmul.f32 %v3936_v63, %v5197_v29  ;;  %v2703_v33 = vpack.c.bf16 %v3369_v58, %v3368_v19 }
 0x304   : > { %v2444_v59 = vpop.f32.mrf.mxu1  ;;  %v2618_v15 = vadd.f32 %v3340_v36, %v3276_v55  ;;  %v3913_v31 = vpop.f32.mrf.mxu0  ;;  %v3283_v22 = vclamps-f32 %v5152_v9, 1000000.0 }
 0x305   : > { %v3341_v53 = vclamps-f32 %v2523_v39, 1000000.0  ;;  %v2521_v2 = vmul.f32 %v2444_v59, %v5202_v57  ;;  %v2702_v10 = vpack.c.bf16 %v3367_v12, %v3366_v24  ;;  %v2616_v28 = vadd.f32 %v3338_v40, %v3274_v62 }
 0x306   : > { %v3939_v60 = vpop.f32.mrf.mxu1  ;;  %v3372_v3 = vclamps-f32 %v2618_v15, 1000000.0 }
 0x307   : > { %v2619_v35 = vadd.f32 %v3341_v53, %v3277_v13  ;;  %v3339_v27 = vclamps-f32 %v2521_v2, 1000000.0  ;;  %v2526_v29 = vmul.f32 %v3939_v60, %v5209_v25  ;;  %3977 = vmatprep.mubr.bf16.mxu0 %v2702_v10  ;;  %v3370_v51 = vclamps-f32 %v2616_v28, 1000000.0 }
 0x308   : > { %v2457_v18 = vpop.f32.mrf.mxu1  ;;  %3978 = vmatmul.mubr.bf16.gmra.mxu0 %v2703_v33  ;;  %v2324_v33 = vpop.f32.mrf.mxu0  ;;  %v3282_v53 = vclamps-f32 %v5147_v16, 1000000.0  ;;  %v3288_v16 = vclamps-f32 %v5177_v42, 1000000.0 }
 0x309   : > { %v3373_v11 = vclamps-f32 %v2619_v35, 1000000.0  ;;  %v2617_v32 = vadd.f32 %v3339_v27, %v3275_v0  ;;  %v2524_v44 = vmul.f32 %v2457_v18, %v5215_v43  ;;  %v3344_v7 = vclamps-f32 %v2526_v29, 1000000.0 }
 0x30a   : > { %v3940_v57 = vpop.f32.mrf.mxu1  ;;  %v3914_v27 = vpop.f32.mrf.mxu0 }
 0x30b   : > { %v2705_v1 = vpack.c.bf16 %v3373_v11, %v3372_v3  ;;  %v3371_v52 = vclamps-f32 %v2617_v32, 1000000.0  ;;  %v3342_v30 = vclamps-f32 %v2524_v44, 1000000.0  ;;  %v2527_v34 = vmul.f32 %v3940_v57, %v5221_v49 }
 0x30c   : > { %v2460_v25 = vpop.f32.mrf.mxu1  ;;  %v2622_v43 = vadd.f32 %v3344_v7, %v3280_v37  ;;  %v3286_v57 = vclamps-f32 %v5167_v4, 1000000.0 }
 0x30d   : > { %v2704_v56 = vpack.c.bf16 %v3371_v52, %v3370_v51  ;;  %v2525_v50 = vmul.f32 %v2460_v25, %v5226_v17  ;;  %v3345_v8 = vclamps-f32 %v2527_v34, 1000000.0  ;;  %v2620_v45 = vadd.f32 %v3342_v30, %v3278_v46  ;;  %v5414_v30 = vld [vmem:[#allocation25_spill] sm:$0xff] }
 0x30e   : > { %v3943_v48 = vpop.f32.mrf.mxu1  ;;  %v3376_v63 = vclamps-f32 %v2622_v43, 1000000.0  ;;  %v3289_v37 = vclamps-f32 %v5414_v30, 1000000.0 }
 0x30f   : > { %3981 = vmatprep.mubr.bf16.mxu0 %v2704_v56  ;;  %v3343_v14 = vclamps-f32 %v2525_v50, 1000000.0  ;;  %v2530_v47 = vmul.f32 %v3943_v48, %v3909_v5  ;;  %v2623_v36 = vadd.f32 %v3345_v8, %v3281_v23  ;;  %v3374_v12 = vclamps-f32 %v2620_v45, 1000000.0  ;;  %v5415_v56 = vld [vmem:[#allocation27_spill] sm:$0xff] }
 0x310   : > { %v2473_v49 = vpop.f32.mrf.mxu1  ;;  %3982 = vmatmul.mubr.bf16.gmra.mxu0 %v2705_v1  ;;  %v3285_v5 = vclamps-f32 %v5162_v6, 1000000.0  ;;  %v2327_v1 = vpop.f32.mrf.mxu0  ;;  %v3287_v50 = vclamps-f32 %v5415_v56, 1000000.0 }
 0x311   : > { %v2621_v19 = vadd.f32 %v3343_v14, %v3279_v26  ;;  %v3348_v54 = vclamps-f32 %v2530_v47, 1000000.0  ;;  %v2528_v58 = vmul.f32 %v2473_v49, %v2308_v21  ;;  %v3377_v17 = vclamps-f32 %v2623_v36, 1000000.0 }
 0x312   : > { %v3944_v55 = vpop.f32.mrf.mxu1 }
 0x313   : > { %v3375_v40 = vclamps-f32 %v2621_v19, 1000000.0  ;;  %v2531_v39 = vmul.f32 %v3944_v55, %v3910_v41  ;;  %v2707_v38 = vpack.c.bf16 %v3377_v17, %v3376_v63  ;;  %v3346_v62 = vclamps-f32 %v2528_v58, 1000000.0 }
 0x314   : > { %v2476_v24 = vpop.f32.mrf.mxu1  ;;  %v2626_v59 = vadd.f32 %v3348_v54, %v3284_v20 }
 0x315   : > { %v2706_v13 = vpack.c.bf16 %v3375_v40, %v3374_v12  ;;  %v3349_v15 = vclamps-f32 %v2531_v39, 1000000.0  ;;  %v2529_v21 = vmul.f32 %v2476_v24, %v2311_v61  ;;  %v2624_v60 = vadd.f32 %v3346_v62, %v3282_v53 }
 0x316   : > { %v3947_v2 = vpop.f32.mrf.mxu1  ;;  %v3380_v29 = vclamps-f32 %v2626_v59, 1000000.0 }
 0x317   : > { %3985 = vmatprep.mubr.bf16.mxu0 %v2706_v13  ;;  %v2627_v0 = vadd.f32 %v3349_v15, %v3285_v5  ;;  %v2534_v10 = vmul.f32 %v3947_v2, %v3913_v31  ;;  %v3347_v28 = vclamps-f32 %v2529_v21, 1000000.0  ;;  %v3378_v51 = vclamps-f32 %v2624_v60, 1000000.0 }
 0x318   : > { %v2489_v35 = vpop.f32.mrf.mxu1  ;;  %3986 = vmatmul.mubr.bf16.gmra.mxu0 %v2707_v38 }
 0x319   : > { %v3381_v18 = vclamps-f32 %v2627_v0, 1000000.0  ;;  %v3352_v6 = vclamps-f32 %v2534_v10, 1000000.0  ;;  %v2532_v41 = vmul.f32 %v2489_v35, %v2324_v33  ;;  %v2625_v3 = vadd.f32 %v3347_v28, %v3283_v22 }
 0x31a   : > { %v3948_v11 = vpop.f32.mrf.mxu1 }
 0x31b   : > { %v2709_v32 = vpack.c.bf16 %v3381_v18, %v3380_v29  ;;  %v3350_v44 = vclamps-f32 %v2532_v41, 1000000.0  ;;  %v2535_v7 = vmul.f32 %v3948_v11, %v3914_v27  ;;  %v3379_v9 = vclamps-f32 %v2625_v3, 1000000.0 }
 0x31c   : > { %v2492_v52 = vpop.f32.mrf.mxu1  ;;  %v2630_v34 = vadd.f32 %v3352_v6, %v3288_v16 }
 0x31d   : > { %v3353_v25 = vclamps-f32 %v2535_v7, 1000000.0  ;;  %v2533_v61 = vmul.f32 %v2492_v52, %v2327_v1  ;;  %v2708_v46 = vpack.c.bf16 %v3379_v9, %v3378_v51  ;;  %v2628_v42 = vadd.f32 %v3350_v44, %v3286_v57 }
 0x31e   : > { %v3384_v8 = vclamps-f32 %v2630_v34, 1000000.0 }
 0x31f   : > { %v2631_v23 = vadd.f32 %v3353_v25, %v3289_v37  ;;  %v3351_v43 = vclamps-f32 %v2533_v61, 1000000.0  ;;  %3989 = vmatprep.mubr.bf16.mxu0 %v2708_v46  ;;  %v3382_v26 = vclamps-f32 %v2628_v42, 1000000.0 }
 0x320   : > { %3990 = vmatmul.mubr.bf16.gmra.mxu0 %v2709_v32 }
 0x321   : > { %v3385_v4 = vclamps-f32 %v2631_v23, 1000000.0  ;;  %v2629_v48 = vadd.f32 %v3351_v43, %v3287_v50 }
 0x323   : > { %v2711_v45 = vpack.c.bf16 %v3385_v4, %v3384_v8  ;;  %v3383_v14 = vclamps-f32 %v2629_v48, 1000000.0 }
 0x325   : > { %v2710_v47 = vpack.c.bf16 %v3383_v14, %v3382_v26 }
 0x327   : > { %3993 = vmatprep.mubr.bf16.mxu0 %v2710_v47 }
 0x328   : > { %3994 = vmatmul.mubr.bf16.gmra.mxu0 %v2711_v45 }
 0x3b0   : > { %v3967_v36 = vpop.f32.mrf.mxu0 }
 0x3b1   : > { %v2939_v49 = vmul.f32 0.35355338, %v3967_v36 }
 0x3b2   : > { %v2810_v31 = vpop.f32.mrf.mxu0 }
 0x3b3   : > { %2971 = vst [vmem:[%s5259_s27 + $0x10] sm:$0xff] %v2939_v49  ;;  %v2937_v19 = vmul.f32 0.35355338, %v2810_v31 }
 0x3b4   : > { %v3968_v54 = vpop.f32.mrf.mxu0 }
 0x3b5   : > { %2969 = vst [vmem:[%s5259_s27] sm:$0xff] %v2937_v19  ;;  %v2940_v58 = vmul.f32 0.35355338, %v3968_v54 }
 0x3b6   : > { %v2813_v63 = vpop.f32.mrf.mxu0 }
 0x3b7   : > { %2972 = vst [vmem:[%s5259_s27 + $0x18] sm:$0xff] %v2940_v58  ;;  %v2938_v17 = vmul.f32 0.35355338, %v2813_v63 }
 0x3b8   : > { %v3971_v55 = vpop.f32.mrf.mxu0 }
 0x3b9   : > { %2970 = vst [vmem:[%s5259_s27 + $0x8] sm:$0xff] %v2938_v17  ;;  %v2943_v20 = vmul.f32 0.35355338, %v3971_v55 }
 0x3ba   : > { %v2826_v12 = vpop.f32.mrf.mxu0 }
 0x3bb   : > { %2975 = vst [vmem:[%s5259_s27 + $0x30] sm:$0xff] %v2943_v20  ;;  %v2941_v40 = vmul.f32 0.35355338, %v2826_v12 }
 0x3bc   : > { %v3972_v39 = vpop.f32.mrf.mxu0 }
 0x3bd   : > { %2973 = vst [vmem:[%s5259_s27 + $0x20] sm:$0xff] %v2941_v40  ;;  %v2944_v38 = vmul.f32 0.35355338, %v3972_v39 }
 0x3be   : > { %v2829_v62 = vpop.f32.mrf.mxu0 }
 0x3bf   : > { %2976 = vst [vmem:[%s5259_s27 + $0x38] sm:$0xff] %v2944_v38  ;;  %v2942_v24 = vmul.f32 0.35355338, %v2829_v62 }
 0x3c0   : > { %v3975_v33 = vpop.f32.mrf.mxu0 }
 0x3c1   : > { %2974 = vst [vmem:[%s5259_s27 + $0x28] sm:$0xff] %v2942_v24  ;;  %v2947_v5 = vmul.f32 0.35355338, %v3975_v33 }
 0x3c2   : > { %v2842_v59 = vpop.f32.mrf.mxu0 }
 0x3c3   : > { %2979 = vst [vmem:[%s5259_s27 + $0x50] sm:$0xff] %v2947_v5  ;;  %v2945_v13 = vmul.f32 0.35355338, %v2842_v59 }
 0x3c4   : > { %v3976_v15 = vpop.f32.mrf.mxu0 }
 0x3c5   : > { %2977 = vst [vmem:[%s5259_s27 + $0x40] sm:$0xff] %v2945_v13  ;;  %v2948_v53 = vmul.f32 0.35355338, %v3976_v15 }
 0x3c6   : > { %v2845_v21 = vpop.f32.mrf.mxu0 }
 0x3c7   : > { %2980 = vst [vmem:[%s5259_s27 + $0x58] sm:$0xff] %v2948_v53  ;;  %v2946_v2 = vmul.f32 0.35355338, %v2845_v21 }
 0x3c8   : > { %v3979_v0 = vpop.f32.mrf.mxu0 }
 0x3c9   : > { %2978 = vst [vmem:[%s5259_s27 + $0x48] sm:$0xff] %v2946_v2  ;;  %v2951_v10 = vmul.f32 0.35355338, %v3979_v0 }
 0x3ca   : > { %v2858_v22 = vpop.f32.mrf.mxu0 }
 0x3cb   : > { %2983 = vst [vmem:[%s5259_s27 + $0x70] sm:$0xff] %v2951_v10  ;;  %v2949_v60 = vmul.f32 0.35355338, %v2858_v22 }
 0x3cc   : > { %v3980_v28 = vpop.f32.mrf.mxu0 }
 0x3cd   : > { %2981 = vst [vmem:[%s5259_s27 + $0x60] sm:$0xff] %v2949_v60  ;;  %v2952_v35 = vmul.f32 0.35355338, %v3980_v28 }
 0x3ce   : > { %v2861_v27 = vpop.f32.mrf.mxu0 }
 0x3cf   : > { %2984 = vst [vmem:[%s5259_s27 + $0x78] sm:$0xff] %v2952_v35  ;;  %v2950_v29 = vmul.f32 0.35355338, %v2861_v27 }
 0x3d0   : > { %v3983_v18 = vpop.f32.mrf.mxu0 }
 0x3d1   : > { %2982 = vst [vmem:[%s5259_s27 + $0x68] sm:$0xff] %v2950_v29  ;;  %v2955_v6 = vmul.f32 0.35355338, %v3983_v18 }
 0x3d2   : > { %v2874_v41 = vpop.f32.mrf.mxu0 }
 0x3d3   : > { %2987 = vst [vmem:[%s5259_s27 + $0x90] sm:$0xff] %v2955_v6  ;;  %v2953_v3 = vmul.f32 0.35355338, %v2874_v41 }
 0x3d4   : > { %v3984_v11 = vpop.f32.mrf.mxu0 }
 0x3d5   : > { %2985 = vst [vmem:[%s5259_s27 + $0x80] sm:$0xff] %v2953_v3  ;;  %v2956_v16 = vmul.f32 0.35355338, %v3984_v11 }
 0x3d6   : > { %v2877_v32 = vpop.f32.mrf.mxu0 }
 0x3d7   : > { %2988 = vst [vmem:[%s5259_s27 + $0x98] sm:$0xff] %v2956_v16  ;;  %v2954_v44 = vmul.f32 0.35355338, %v2877_v32 }
 0x3d8   : > { %v3987_v7 = vpop.f32.mrf.mxu0 }
 0x3d9   : > { %2986 = vst [vmem:[%s5259_s27 + $0x88] sm:$0xff] %v2954_v44  ;;  %v2959_v57 = vmul.f32 0.35355338, %v3987_v7 }
 0x3da   : > { %v2890_v51 = vpop.f32.mrf.mxu0 }
 0x3db   : > { %2991 = vst [vmem:[%s5259_s27 + $0xb0] sm:$0xff] %v2959_v57  ;;  %v2957_v9 = vmul.f32 0.35355338, %v2890_v51 }
 0x3dc   : > { %v3988_v1 = vpop.f32.mrf.mxu0 }
 0x3dd   : > { %2989 = vst [vmem:[%s5259_s27 + $0xa0] sm:$0xff] %v2957_v9  ;;  %v2960_v52 = vmul.f32 0.35355338, %v3988_v1 }
 0x3de   : > { %v2893_v30 = vpop.f32.mrf.mxu0 }
 0x3df   : > { %2992 = vst [vmem:[%s5259_s27 + $0xb8] sm:$0xff] %v2960_v52  ;;  %v2958_v37 = vmul.f32 0.35355338, %v2893_v30 }
 0x3e0   : > { %v3991_v34 = vpop.f32.mrf.mxu0 }
 0x3e1   : > { %2990 = vst [vmem:[%s5259_s27 + $0xa8] sm:$0xff] %v2958_v37  ;;  %v2963_v25 = vmul.f32 0.35355338, %v3991_v34 }
 0x3e2   : > { %v2906_v61 = vpop.f32.mrf.mxu0 }
 0x3e3   : > { %2995 = vst [vmem:[%s5259_s27 + $0xd0] sm:$0xff] %v2963_v25  ;;  %v2961_v46 = vmul.f32 0.35355338, %v2906_v61 }
 0x3e4   : > { %v3992_v56 = vpop.f32.mrf.mxu0 }
 0x3e5   : > { %2993 = vst [vmem:[%s5259_s27 + $0xc0] sm:$0xff] %v2961_v46  ;;  %v2964_v50 = vmul.f32 0.35355338, %v3992_v56 }
 0x3e6   : > { %v2909_v42 = vpop.f32.mrf.mxu0 }
 0x3e7   : > { %2996 = vst [vmem:[%s5259_s27 + $0xd8] sm:$0xff] %v2964_v50  ;;  %v2962_v23 = vmul.f32 0.35355338, %v2909_v42 }
 0x3e8   : > { %v3995_v43 = vpop.f32.mrf.mxu0 }
 0x3e9   : > { %2994 = vst [vmem:[%s5259_s27 + $0xc8] sm:$0xff] %v2962_v23  ;;  %v2967_v8 = vmul.f32 0.35355338, %v3995_v43 }
 0x3ea   : > { %v2922_v4 = vpop.f32.mrf.mxu0 }
 0x3eb   : > { %2999 = vst [vmem:[%s5259_s27 + $0xf0] sm:$0xff] %v2967_v8  ;;  %v2965_v48 = vmul.f32 0.35355338, %v2922_v4 }
 0x3ec   : > { %v3996_v26 = vpop.f32.mrf.mxu0 }
 0x3ed   : > { %2997 = vst [vmem:[%s5259_s27 + $0xe0] sm:$0xff] %v2965_v48  ;;  %v2968_v45 = vmul.f32 0.35355338, %v3996_v26 }
 0x3ee   : > { %v2925_v14 = vpop.f32.mrf.mxu0 }
 0x3ef   : > { %3000 = vst [vmem:[%s5259_s27 + $0xf8] sm:$0xff] %v2968_v45  ;;  %v2966_v47 = vmul.f32 0.35355338, %v2925_v14 }
 0x3f1   : > { %2998 = vst [vmem:[%s5259_s27 + $0xe8] sm:$0xff] %v2966_v47 }
 0x3f2   : > { %4082 = shalt.err (!%p4079_p6)
}
 0x3f3   : > { %s4083_s17 = scalar_lea.hbm %s5296_s12, 4096  ;;  %s4087_s20 = scalar_lea.hbm %s5355_s6, 8192 }
 0x3f4   : > { %p4084_p7 = scmp.ne.s32.totalorder %s5296_s12, %s4083_s17  ;;  %p4088_p11 = scmp.lt.s32.totalorder %s5296_s12, %s5355_s6 }
 0x3f5   : > { %p4089_p12 = scmp.lt.s32.totalorder %s4087_s20, %s4083_s17 }
 0x3f6   : > { %p4085_p9 = pnand %p4084_p7, %p4225_p4 }
 0x3f7   : > { %p4090_p13 = por %p4089_p12, %p4088_p11 }
 0x3f8   : > { %p4086_p10 = pneg %p4085_p9 }
 0x3fa   : > { %p4091_p0 = pnand %p4090_p13, %p4086_p10 }
 0x3fc   : > { %4094 = shalt.err (!%p4091_p0)
}
 0x3fd   : > { %s4148_s8 = smov 128   ;;  %s4149_s11 = smov 8  }
 0x3fe   : > { %4004 = dma.vmem_to_hbm [thread:$0]  (%p4225_p4), %s5298_s30, 4096, %s5296_s12, %s5304_s24, %s4148_s8, %s4148_s8, %s4149_s11  }
 0x3ff PF: > { %p4010_p1 = scmp.ge.s32.totalorder %s4145_s26, 2  ;;  %s3030_s13 = sand.u32 1, %s4125_s21  }
 0x400   : > { %s3031_s14 = scalar_lea.sflag [#allocation4], %s3030_s13 }
 0x401   : > { %p4007_p2 = pnand %p4010_p1, %p4232_p8 }
 0x403   : > { %p4008_p3 = pneg %p4007_p2 }
 0x405   : > { %4120 = dma.done.wait (%p4008_p3), %s3031_s14, 4096  }
 0x406   : > { %4122 = vsyncadd (%p4008_p3), %s3031_s14, 4294963200  ;;  %s19_s26 = sadd.s32 1, %s4145_s26   ;;  %s5416_s21 = smov %s4129_s22 }
 0x407   : > { %p16_p5 = scmp.ge.s32.totalorder %s19_s26, 4   ;;  %s5417_s22 = smov %s4133_s23 }
 0x408   : > { %s5418_s23 = smov %s4238_s10  ;;  %s5419_s24 = smov %s4141_s25 }
 0x409   : > { %s5420_s25 = smov %s5422_s29  ;;  %18 = sbr.rel (!%p16_p5) target bundleno = 4 (0x4), region = 93 }
 0x40e   :  { %3036 = vsyncpa [#allocation4], 1 }
 0x40f   :  { %3038 = vsyncpa [#allocation4 + $0x1], 1 }

</bundles_post_ra>
